<compile_context>
chip_gen: v6e
topology: v6e:2x2x1
jax: 0.10.0
libtpu: 0.0.40
codegen_flags: <defaults>
</compile_context>

<pallas_src>
import jax
import jax.numpy as jnp
import numpy as np
from jax.experimental import pallas as pl
from jax.experimental.pallas import tpu as pltpu

BN_EPS = 1e-5
MXU_DTYPE = jnp.bfloat16   # MXU operand dtype; accumulation is always f32.


# ---------------------------------------------------------------------------
# Fused kernel
# ---------------------------------------------------------------------------
def dqn_fused_kernel(x_ref,
                     wb1_ref, b1_ref,
                     wb2_ref, b2_ref,
                     wb3_ref, b3_ref,
                     wf1_ref, bf1_ref,
                     wf2_ref, bf2_ref,
                     q_ref,
                     pad1_ref, pad2_ref, a3_ref):
    """Whole DQN forward for one batch tile.

    Activations are (bn, h(+2), w*C): width and channels folded into lanes.
    A 3x3 conv (stride 1, pad 1) is three matmuls, one per kernel row kh,
    against a width-banded (w*Cin, w*Cout) weight.  Zero padding in W lives in
    the band's zero blocks; zero padding in H lives in the halo rows of the
    pad*_ref scratch buffers (rewritten every grid step -> megacore-safe).
    """
    bn = x_ref.shape[0]
    h = x_ref.shape[1] - 2           # input arrives with one halo row top/bottom

    def conv_bn_relu(src_ref, wb_ref, bias_ref):
        # src_ref: (bn, h+2, w*Cin) f32, rows 0 and h+1 are zero.
        # wb_ref:  (3, w*Cin, w*Cout) bf16 banded weights (BN scale folded in).
        # bias_ref:(1, w*Cout) f32 folded BN bias (tiled over w).
        l_in = src_ref.shape[2]
        l_out = wb_ref.shape[2]
        acc = None
        for kh in range(3):          # padded rows kh..kh+h-1 <=> image rows kh-1..kh+h-2
            lhs = src_ref[:, kh:kh + h, :].reshape(bn * h, l_in).astype(MXU_DTYPE)
            part = jnp.dot(lhs, wb_ref[kh], preferred_element_type=jnp.float32)
            acc = part if acc is None else acc + part
        out = jnp.maximum(acc + bias_ref[0, :], 0.0)      # (bn*h, w*Cout), f32
        return out.reshape(bn, h, l_out)

    def store_padded(dst_ref, a):
        # Interior rows get the activation; halo rows are (re)zeroed each step,
        # providing the next conv's zero padding in H.
        l = a.shape[-1]
        dst_ref[:, 0:1, :] = jnp.zeros((bn, 1, l), jnp.float32)
        dst_ref[:, h + 1:h + 2, :] = jnp.zeros((bn, 1, l), jnp.float32)
        dst_ref[:, 1:h + 1, :] = a

    a1 = conv_bn_relu(x_ref, wb1_ref, b1_ref)      # (bn, h, w*8)
    store_padded(pad1_ref, a1)
    a2 = conv_bn_relu(pad1_ref, wb2_ref, b2_ref)   # (bn, h, w*16)
    store_padded(pad2_ref, a2)
    a3 = conv_bn_relu(pad2_ref, wb3_ref, b3_ref)   # (bn, h, w*32)
    a3_ref[...] = a3

    # Flatten (h, w, c) into lanes: each row chunk is w*32 = 256 lanes, so the
    # lane concat happens at 128-aligned offsets (no masked stores).  fc1's
    # weight rows were permuted at parameter-prep time to this (h, w, c) order.
    flat = jnp.concatenate([a3_ref[:, i, :] for i in range(h)], axis=-1)

    hidden = jnp.dot(flat.astype(MXU_DTYPE), wf1_ref[...],
                     preferred_element_type=jnp.float32) + bf1_ref[0, :]
    hidden = jnp.maximum(hidden, 0.0)
    q = jnp.dot(hidden.astype(MXU_DTYPE), wf2_ref[...],
                preferred_element_type=jnp.float32) + bf2_ref[0, :]
    q_ref[...] = q.astype(q_ref.dtype)


# ---------------------------------------------------------------------------
# Wrapper: single pallas_call for the whole forward
# ---------------------------------------------------------------------------
def dqn_forward(kparams, x_nchw, num_actions):
    """Fused DQN forward.  x_nchw: (N, 5, H, W) torch-layout input."""
    n, cin, h, w = x_nchw.shape
    wb1, b1 = kparams["conv1"]["w"], kparams["conv1"]["b"]
    wb2, b2 = kparams["conv2"]["w"], kparams["conv2"]["b"]
    wb3, b3 = kparams["conv3"]["w"], kparams["conv3"]["b"]
    wf1, bf1 = kparams["fc1"]["w"], kparams["fc1"]["b"]
    wf2, bf2 = kparams["fc2"]["w"], kparams["fc2"]["b"]

    l0 = w * cin
    l1, l2, l3 = wb1.shape[2], wb2.shape[2], wb3.shape[2]
    hid = wf1.shape[1]
    q_cols = wf2.shape[1]            # padded to 128 lanes at prepare_params time
    assert wb1.shape[1] == l0 and wf1.shape[0] == h * l3

    # Boundary relayout (cheap XLA ops on a tiny array):
    # NCHW -> (N, H, W*Cin) with (w, c) lane order, plus one zero halo row
    # above/below the image (conv1's zero padding in H).
    x = jnp.transpose(x_nchw, (0, 2, 3, 1)).astype(jnp.float32).reshape(n, h, l0)
    x = jnp.pad(x, ((0, 0), (1, 1), (0, 0)))

    # Batch tile: full batch for tiny n; otherwise a multiple of 8 capped at 64
    # with >=2 grid steps so the "parallel" axis shards across v7x's two cores.
    # The batch is zero-padded to a multiple of the tile (padded rows sliced off).
    if n <= 8:
        bn = n
    else:
        bn = min(64, 8 * ((n + 15) // 16))
    n_pad = ((n + bn - 1) // bn) * bn
    if n_pad != n:
        x = jnp.pad(x, ((0, n_pad - n), (0, 0), (0, 0)))
    grid = (n_pad // bn,)

    operands = [x, wb1, b1, wb2, b2, wb3, b3, wf1, bf1, wf2, bf2]
    in_specs = [pl.BlockSpec((bn, h + 2, l0), lambda i: (i, 0, 0))]
    for arr in operands[1:]:
        if arr.ndim == 3:
            in_specs.append(pl.BlockSpec(arr.shape, lambda i: (0, 0, 0)))
        else:
            in_specs.append(pl.BlockSpec(arr.shape, lambda i: (0, 0)))

    flops = (2 * n_pad * h * 3 * (l0 * l1 + l1 * l2 + l2 * l3)
             + 2 * n_pad * (h * l3 * hid + hid * q_cols))
    bytes_accessed = (sum(int(a.size) * a.dtype.itemsize for a in operands)
                      + n_pad * q_cols * 4)

    q_pad = pl.pallas_call(
        dqn_fused_kernel,
        out_shape=jax.ShapeDtypeStruct((n_pad, q_cols), jnp.float32),
        grid=grid,
        in_specs=in_specs,
        out_specs=pl.BlockSpec((bn, q_cols), lambda i: (i, 0)),
        scratch_shapes=[
            pltpu.VMEM((bn, h + 2, l1), jnp.float32),   # conv1 out + H halo
            pltpu.VMEM((bn, h + 2, l2), jnp.float32),   # conv2 out + H halo
            pltpu.VMEM((bn, h, l3), jnp.float32),       # conv3 out (flatten src)
        ],
        compiler_params=pltpu.CompilerParams(
            dimension_semantics=("parallel",)),
        cost_estimate=pl.CostEstimate(flops=flops, transcendentals=0,
                                      bytes_accessed=bytes_accessed),
    )(*operands)

    return q_pad[:n, :num_actions]


# ---------------------------------------------------------------------------
# Parameters: torch-layout init + one-time re-layout for the kernel
# ---------------------------------------------------------------------------
def init_torch_params(key, in_channels=5, num_actions=6, h=8, w=8):
    """Deterministic parameters in PyTorch layouts (Conv2d OIHW, Linear (out,in))."""
    channels = [in_channels, 8, 16, 32]
    keys = iter(jax.random.split(key, 24))
    params = {}
    for i in range(3):
        cin, cout = channels[i], channels[i + 1]
        params[f"conv{i + 1}"] = dict(
            w=jax.random.normal(next(keys), (cout, cin, 3, 3), jnp.float32) * 0.1,
            b=jax.random.normal(next(keys), (cout,), jnp.float32) * 0.05,
            gamma=1.0 + 0.1 * jax.random.normal(next(keys), (cout,), jnp.float32),
            beta=0.05 * jax.random.normal(next(keys), (cout,), jnp.float32),
            mean=0.02 * jnp.arange(cout, dtype=jnp.float32),
            var=1.0 + 0.1 * jnp.abs(jax.random.normal(next(keys), (cout,), jnp.float32)),
        )
    conv_out = channels[-1] * h * w
    params["fc1"] = dict(
        w=jax.random.normal(next(keys), (128, conv_out), jnp.float32) * 0.02,
        b=jnp.zeros((128,), jnp.float32))
    params["fc2"] = dict(
        w=jax.random.normal(next(keys), (num_actions, 128), jnp.float32) * 0.1,
        b=0.01 * jnp.arange(num_actions, dtype=jnp.float32))
    return params


def prepare_params(tp, h=8, w=8, q_pad_to=128):
    """Fold eval-mode BN and re-layout weights for the fused kernel (one time).

    conv : (Cout, Cin, 3, 3) -> banded (3, w*Cin, w*Cout).  Band kh maps the
           (j, c)-on-lanes input row to the (j, c)-on-lanes output row for all
           kw taps at once; out-of-range j+kw-1 entries stay zero (= conv's
           zero padding in W).  BN scale is folded into the weights in f32
           before the bf16 cast; the folded bias is tiled to (1, w*Cout).
    fc1  : rows permuted from torch's NCHW x.view(N, -1) order to the kernel's
           (h, w, c) flatten order -> no runtime transpose.
    fc2  : transposed and zero-padded to 128 output lanes (lane-dense store);
           the wrapper slices back to num_actions.
    """
    kp = {}
    for i in range(3):
        c = tp[f"conv{i + 1}"]
        wt = np.asarray(c["w"], np.float32)                       # (Co, Ci, 3, 3)
        co, ci = wt.shape[0], wt.shape[1]
        scale = np.asarray(c["gamma"], np.float32) / np.sqrt(
            np.asarray(c["var"], np.float32) + BN_EPS)
        bias = (np.asarray(c["beta"], np.float32)
                + (np.asarray(c["b"], np.float32)
                   - np.asarray(c["mean"], np.float32)) * scale)
        wt = wt * scale[:, None, None, None]                      # fold BN scale (f32)
        band = np.zeros((3, w * ci, w * co), np.float32)
        for kh in range(3):
            for kw in range(3):
                blk = wt[:, :, kh, kw].T                          # (Ci, Co)
                for j in range(w):
                    jp = j + kw - 1
                    if 0 <= jp < w:
                        band[kh, jp * ci:(jp + 1) * ci, j * co:(j + 1) * co] = blk
        kp[f"conv{i + 1}"] = dict(
            w=jnp.asarray(band, MXU_DTYPE),
            b=jnp.asarray(np.tile(bias, w).reshape(1, w * co), jnp.float32))

    c3 = tp["conv3"]["w"].shape[0]
    hid = tp["fc1"]["w"].shape[0]
    w1 = np.asarray(tp["fc1"]["w"], np.float32)                   # (hid, c3*h*w) NCHW order
    w1 = w1.reshape(hid, c3, h, w).transpose(2, 3, 1, 0).reshape(h * w * c3, hid)
    kp["fc1"] = dict(w=jnp.asarray(w1, MXU_DTYPE),
                     b=jnp.asarray(np.asarray(tp["fc1"]["b"], np.float32).reshape(1, hid)))

    w2 = np.asarray(tp["fc2"]["w"], np.float32)                   # (A, hid)
    na = w2.shape[0]
    w2p = np.zeros((hid, q_pad_to), np.float32)
    w2p[:, :na] = w2.T
    b2p = np.zeros((1, q_pad_to), np.float32)
    b2p[0, :na] = np.asarray(tp["fc2"]["b"], np.float32)
    kp["fc2"] = dict(w=jnp.asarray(w2p, MXU_DTYPE), b=jnp.asarray(b2p))
    return kp


# ---------------------------------------------------------------------------
# Pure-JAX reference (torch semantics, eval-mode BN) for verification
# ---------------------------------------------------------------------------
def dqn_reference(tp, x_nchw):
    hp = jax.lax.Precision.HIGHEST
    x = x_nchw.astype(jnp.float32)
    for i in range(3):
        c = tp[f"conv{i + 1}"]
        x = jax.lax.conv_general_dilated(
            x, c["w"], window_strides=(1, 1), padding=((1, 1), (1, 1)),
            dimension_numbers=("NCHW", "OIHW", "NCHW"), precision=hp)
        x = x + c["b"][None, :, None, None]
        x = (x - c["mean"][None, :, None, None]) * (
            c["gamma"][None, :, None, None]
            / jnp.sqrt(c["var"][None, :, None, None] + BN_EPS))
        x = x + c["beta"][None, :, None, None]
        x = jnp.maximum(x, 0.0)
    x = x.reshape(x.shape[0], -1)            # torch x.view(N, -1) on NCHW
    hdn = jnp.maximum(jnp.dot(x, tp["fc1"]["w"].T, precision=hp) + tp["fc1"]["b"], 0.0)
    return jnp.dot(hdn, tp["fc2"]["w"].T, precision=hp) + tp["fc2"]["b"]


if __name__ == "__main__":
    # input_shape implied by the module: (H, W, 5); forward receives NCHW.
    batch, in_ch, H, W = 2, 5, 8, 8
    num_actions = 6

    key = jax.random.PRNGKey(0)
    k_params, k_x = jax.random.split(key)
    torch_params = init_torch_params(k_params, in_channels=in_ch,
                                     num_actions=num_actions, h=H, w=W)
    kernel_params = prepare_params(torch_params, h=H, w=W)
    x = jax.random.normal(k_x, (batch, in_ch, H, W), jnp.float32)

    fwd = jax.jit(dqn_forward, static_argnames=("num_actions",))
    q_values = fwd(kernel_params, x, num_actions=num_actions)
    jax.block_until_ready(q_values)

    assert q_values.shape == (batch, num_actions), q_values.shape
    assert bool(jnp.all(jnp.isfinite(q_values)))

    # Verify the banded-conv layout, BN fold and fc1 row permutation against the
    # pure-JAX reference (tolerance covers bf16 MXU operands; accumulation f32).
    q_ref = dqn_reference(torch_params, x)
    np.testing.assert_allclose(np.asarray(q_values), np.asarray(q_ref),
                               rtol=5e-2, atol=5e-2)
    print("KERNEL_OK")
</pallas_src>

<mosaic_0001>
module attributes {stable_mosaic.version = 11 : i64} {
  func.func @dqn_fused_kernel(%arg0: i32, %arg1: memref<2x10x40xf32, #tpu.memory_space<vmem>>, %arg2: memref<3x40x64xbf16, #tpu.memory_space<vmem>>, %arg3: memref<1x64xf32, #tpu.memory_space<vmem>>, %arg4: memref<3x64x128xbf16, #tpu.memory_space<vmem>>, %arg5: memref<1x128xf32, #tpu.memory_space<vmem>>, %arg6: memref<3x128x256xbf16, #tpu.memory_space<vmem>>, %arg7: memref<1x256xf32, #tpu.memory_space<vmem>>, %arg8: memref<2048x128xbf16, #tpu.memory_space<vmem>>, %arg9: memref<1x128xf32, #tpu.memory_space<vmem>>, %arg10: memref<128x128xbf16, #tpu.memory_space<vmem>>, %arg11: memref<1x128xf32, #tpu.memory_space<vmem>>, %arg12: memref<2x128xf32, #tpu.memory_space<vmem>>, %arg13: memref<2x10x64xf32, #tpu.memory_space<vmem>>, %arg14: memref<2x10x128xf32, #tpu.memory_space<vmem>>, %arg15: memref<2x8x256xf32, #tpu.memory_space<vmem>>) attributes {dimension_semantics = [#tpu.dimension_semantics<parallel>], iteration_bounds = array<i64: 1>, scalar_prefetch = 0 : i64, scratch_operands = 3 : i64, tpu.core_type = #tpu.core_type<tc>, window_params = [{transform_indices = @transform_0, window_bounds = array<i64: 2, 10, 40>}, {pipeline_mode = #tpu.pipeline_mode<synchronous>, transform_indices = @transform_1, window_bounds = array<i64: 3, 40, 64>}, {pipeline_mode = #tpu.pipeline_mode<synchronous>, transform_indices = @transform_2, window_bounds = array<i64: 1, 64>}, {pipeline_mode = #tpu.pipeline_mode<synchronous>, transform_indices = @transform_3, window_bounds = array<i64: 3, 64, 128>}, {pipeline_mode = #tpu.pipeline_mode<synchronous>, transform_indices = @transform_4, window_bounds = array<i64: 1, 128>}, {pipeline_mode = #tpu.pipeline_mode<synchronous>, transform_indices = @transform_5, window_bounds = array<i64: 3, 128, 256>}, {pipeline_mode = #tpu.pipeline_mode<synchronous>, transform_indices = @transform_6, window_bounds = array<i64: 1, 256>}, {pipeline_mode = #tpu.pipeline_mode<synchronous>, transform_indices = @transform_7, window_bounds = array<i64: 2048, 128>}, {pipeline_mode = #tpu.pipeline_mode<synchronous>, transform_indices = @transform_8, window_bounds = array<i64: 1, 128>}, {pipeline_mode = #tpu.pipeline_mode<synchronous>, transform_indices = @transform_9, window_bounds = array<i64: 128, 128>}, {pipeline_mode = #tpu.pipeline_mode<synchronous>, transform_indices = @transform_10, window_bounds = array<i64: 1, 128>}, {transform_indices = @transform_11, window_bounds = array<i64: 2, 128>}]} {
    %c0 = arith.constant 0 : index
    %c0_0 = arith.constant 0 : index
    %c0_1 = arith.constant 0 : index
    %0 = vector.load %arg1[%c0, %c0_0, %c0_1] : memref<2x10x40xf32, #tpu.memory_space<vmem>>, vector<2x8x40xf32>
    %1 = vector.shape_cast %0 : vector<2x8x40xf32> to vector<16x40xf32>
    %2 = arith.truncf %1 : vector<16x40xf32> to vector<16x40xbf16>
    %c0_2 = arith.constant 0 : index
    %c0_3 = arith.constant 0 : index
    %c0_4 = arith.constant 0 : index
    %3 = vector.load %arg2[%c0_2, %c0_3, %c0_4] : memref<3x40x64xbf16, #tpu.memory_space<vmem>>, vector<1x40x64xbf16>
    %4 = vector.shape_cast %3 : vector<1x40x64xbf16> to vector<40x64xbf16>
    %cst = arith.constant dense<0.000000e+00> : vector<16x64xf32>
    %5 = tpu.matmul %2, %4, %cst {dimension_numbers = #tpu.dot_dimension_numbers<[1], [0], [0], [1], [0, 0, 1, 1], [], []>} : vector<16x40xbf16>, vector<40x64xbf16>, vector<16x64xf32> -> vector<16x64xf32>
    %c0_5 = arith.constant 0 : index
    %c1 = arith.constant 1 : index
    %c0_6 = arith.constant 0 : index
    %6 = vector.load %arg1[%c0_5, %c1, %c0_6] : memref<2x10x40xf32, #tpu.memory_space<vmem>>, vector<2x8x40xf32>
    %7 = vector.shape_cast %6 : vector<2x8x40xf32> to vector<16x40xf32>
    %8 = arith.truncf %7 : vector<16x40xf32> to vector<16x40xbf16>
    %c1_7 = arith.constant 1 : index
    %c0_8 = arith.constant 0 : index
    %c0_9 = arith.constant 0 : index
    %9 = vector.load %arg2[%c1_7, %c0_8, %c0_9] : memref<3x40x64xbf16, #tpu.memory_space<vmem>>, vector<1x40x64xbf16>
    %10 = vector.shape_cast %9 : vector<1x40x64xbf16> to vector<40x64xbf16>
    %cst_10 = arith.constant dense<0.000000e+00> : vector<16x64xf32>
    %11 = tpu.matmul %8, %10, %cst_10 {dimension_numbers = #tpu.dot_dimension_numbers<[1], [0], [0], [1], [0, 0, 1, 1], [], []>} : vector<16x40xbf16>, vector<40x64xbf16>, vector<16x64xf32> -> vector<16x64xf32>
    %12 = arith.addf %5, %11 : vector<16x64xf32>
    %c0_11 = arith.constant 0 : index
    %c2 = arith.constant 2 : index
    %c0_12 = arith.constant 0 : index
    %13 = vector.load %arg1[%c0_11, %c2, %c0_12] : memref<2x10x40xf32, #tpu.memory_space<vmem>>, vector<2x8x40xf32>
    %14 = vector.shape_cast %13 : vector<2x8x40xf32> to vector<16x40xf32>
    %15 = arith.truncf %14 : vector<16x40xf32> to vector<16x40xbf16>
    %c2_13 = arith.constant 2 : index
    %c0_14 = arith.constant 0 : index
    %c0_15 = arith.constant 0 : index
    %16 = vector.load %arg2[%c2_13, %c0_14, %c0_15] : memref<3x40x64xbf16, #tpu.memory_space<vmem>>, vector<1x40x64xbf16>
    %17 = vector.shape_cast %16 : vector<1x40x64xbf16> to vector<40x64xbf16>
    %cst_16 = arith.constant dense<0.000000e+00> : vector<16x64xf32>
    %18 = tpu.matmul %15, %17, %cst_16 {dimension_numbers = #tpu.dot_dimension_numbers<[1], [0], [0], [1], [0, 0, 1, 1], [], []>} : vector<16x40xbf16>, vector<40x64xbf16>, vector<16x64xf32> -> vector<16x64xf32>
    %19 = arith.addf %12, %18 : vector<16x64xf32>
    %c0_17 = arith.constant 0 : index
    %c0_18 = arith.constant 0 : index
    %20 = vector.load %arg3[%c0_17, %c0_18] : memref<1x64xf32, #tpu.memory_space<vmem>>, vector<1x64xf32>
    %21 = vector.shape_cast %20 : vector<1x64xf32> to vector<64xf32>
    %22 = vector.shape_cast %21 : vector<64xf32> to vector<1x64xf32>
    %23 = vector.broadcast %22 : vector<1x64xf32> to vector<16x64xf32>
    %24 = arith.addf %19, %23 : vector<16x64xf32>
    %cst_19 = arith.constant 0.000000e+00 : f32
    %25 = vector.broadcast %cst_19 : f32 to vector<16x64xf32>
    %26 = arith.maximumf %24, %25 : vector<16x64xf32>
    %27 = vector.shape_cast %26 : vector<16x64xf32> to vector<2x8x64xf32>
    %cst_20 = arith.constant 0.000000e+00 : f32
    %28 = vector.broadcast %cst_20 : f32 to vector<2x1x64xf32>
    %c0_21 = arith.constant 0 : index
    %c0_22 = arith.constant 0 : index
    %c0_23 = arith.constant 0 : index
    %29 = vector.load %arg13[%c0_21, %c0_22, %c0_23] : memref<2x10x64xf32, #tpu.memory_space<vmem>>, vector<2x1x64xf32>
    tpu.vector_store %arg13[%c0_21, %c0_22, %c0_23], %28 {strides = array<i32>} : memref<2x10x64xf32, #tpu.memory_space<vmem>>, vector<2x1x64xf32>,
    %cst_24 = arith.constant 0.000000e+00 : f32
    %30 = vector.broadcast %cst_24 : f32 to vector<2x1x64xf32>
    %c0_25 = arith.constant 0 : index
    %c9 = arith.constant 9 : index
    %c0_26 = arith.constant 0 : index
    %31 = vector.load %arg13[%c0_25, %c9, %c0_26] : memref<2x10x64xf32, #tpu.memory_space<vmem>>, vector<2x1x64xf32>
    tpu.vector_store %arg13[%c0_25, %c9, %c0_26], %30 {strides = array<i32>} : memref<2x10x64xf32, #tpu.memory_space<vmem>>, vector<2x1x64xf32>,
    %c0_27 = arith.constant 0 : index
    %c1_28 = arith.constant 1 : index
    %c0_29 = arith.constant 0 : index
    %32 = vector.load %arg13[%c0_27, %c1_28, %c0_29] : memref<2x10x64xf32, #tpu.memory_space<vmem>>, vector<2x8x64xf32>
    tpu.vector_store %arg13[%c0_27, %c1_28, %c0_29], %27 {strides = array<i32>} : memref<2x10x64xf32, #tpu.memory_space<vmem>>, vector<2x8x64xf32>,
    %c0_30 = arith.constant 0 : index
    %c0_31 = arith.constant 0 : index
    %c0_32 = arith.constant 0 : index
    %33 = vector.load %arg13[%c0_30, %c0_31, %c0_32] : memref<2x10x64xf32, #tpu.memory_space<vmem>>, vector<2x8x64xf32>
    %34 = vector.shape_cast %33 : vector<2x8x64xf32> to vector<16x64xf32>
    %35 = arith.truncf %34 : vector<16x64xf32> to vector<16x64xbf16>
    %c0_33 = arith.constant 0 : index
    %c0_34 = arith.constant 0 : index
    %c0_35 = arith.constant 0 : index
    %36 = vector.load %arg4[%c0_33, %c0_34, %c0_35] : memref<3x64x128xbf16, #tpu.memory_space<vmem>>, vector<1x64x128xbf16>
    %37 = vector.shape_cast %36 : vector<1x64x128xbf16> to vector<64x128xbf16>
    %cst_36 = arith.constant dense<0.000000e+00> : vector<16x128xf32>
    %38 = tpu.matmul %35, %37, %cst_36 {dimension_numbers = #tpu.dot_dimension_numbers<[1], [0], [0], [1], [0, 0, 1, 1], [], []>} : vector<16x64xbf16>, vector<64x128xbf16>, vector<16x128xf32> -> vector<16x128xf32>
    %c0_37 = arith.constant 0 : index
    %c1_38 = arith.constant 1 : index
    %c0_39 = arith.constant 0 : index
    %39 = vector.load %arg13[%c0_37, %c1_38, %c0_39] : memref<2x10x64xf32, #tpu.memory_space<vmem>>, vector<2x8x64xf32>
    %40 = vector.shape_cast %39 : vector<2x8x64xf32> to vector<16x64xf32>
    %41 = arith.truncf %40 : vector<16x64xf32> to vector<16x64xbf16>
    %c1_40 = arith.constant 1 : index
    %c0_41 = arith.constant 0 : index
    %c0_42 = arith.constant 0 : index
    %42 = vector.load %arg4[%c1_40, %c0_41, %c0_42] : memref<3x64x128xbf16, #tpu.memory_space<vmem>>, vector<1x64x128xbf16>
    %43 = vector.shape_cast %42 : vector<1x64x128xbf16> to vector<64x128xbf16>
    %cst_43 = arith.constant dense<0.000000e+00> : vector<16x128xf32>
    %44 = tpu.matmul %41, %43, %cst_43 {dimension_numbers = #tpu.dot_dimension_numbers<[1], [0], [0], [1], [0, 0, 1, 1], [], []>} : vector<16x64xbf16>, vector<64x128xbf16>, vector<16x128xf32> -> vector<16x128xf32>
    %45 = arith.addf %38, %44 : vector<16x128xf32>
    %c0_44 = arith.constant 0 : index
    %c2_45 = arith.constant 2 : index
    %c0_46 = arith.constant 0 : index
    %46 = vector.load %arg13[%c0_44, %c2_45, %c0_46] : memref<2x10x64xf32, #tpu.memory_space<vmem>>, vector<2x8x64xf32>
    %47 = vector.shape_cast %46 : vector<2x8x64xf32> to vector<16x64xf32>
    %48 = arith.truncf %47 : vector<16x64xf32> to vector<16x64xbf16>
    %c2_47 = arith.constant 2 : index
    %c0_48 = arith.constant 0 : index
    %c0_49 = arith.constant 0 : index
    %49 = vector.load %arg4[%c2_47, %c0_48, %c0_49] : memref<3x64x128xbf16, #tpu.memory_space<vmem>>, vector<1x64x128xbf16>
    %50 = vector.shape_cast %49 : vector<1x64x128xbf16> to vector<64x128xbf16>
    %cst_50 = arith.constant dense<0.000000e+00> : vector<16x128xf32>
    %51 = tpu.matmul %48, %50, %cst_50 {dimension_numbers = #tpu.dot_dimension_numbers<[1], [0], [0], [1], [0, 0, 1, 1], [], []>} : vector<16x64xbf16>, vector<64x128xbf16>, vector<16x128xf32> -> vector<16x128xf32>
    %52 = arith.addf %45, %51 : vector<16x128xf32>
    %c0_51 = arith.constant 0 : index
    %c0_52 = arith.constant 0 : index
    %53 = vector.load %arg5[%c0_51, %c0_52] : memref<1x128xf32, #tpu.memory_space<vmem>>, vector<1x128xf32>
    %54 = vector.shape_cast %53 : vector<1x128xf32> to vector<128xf32>
    %55 = vector.shape_cast %54 : vector<128xf32> to vector<1x128xf32>
    %56 = vector.broadcast %55 : vector<1x128xf32> to vector<16x128xf32>
    %57 = arith.addf %52, %56 : vector<16x128xf32>
    %cst_53 = arith.constant 0.000000e+00 : f32
    %58 = vector.broadcast %cst_53 : f32 to vector<16x128xf32>
    %59 = arith.maximumf %57, %58 : vector<16x128xf32>
    %60 = vector.shape_cast %59 : vector<16x128xf32> to vector<2x8x128xf32>
    %cst_54 = arith.constant 0.000000e+00 : f32
    %61 = vector.broadcast %cst_54 : f32 to vector<2x1x128xf32>
    %c0_55 = arith.constant 0 : index
    %c0_56 = arith.constant 0 : index
    %c0_57 = arith.constant 0 : index
    %62 = vector.load %arg14[%c0_55, %c0_56, %c0_57] : memref<2x10x128xf32, #tpu.memory_space<vmem>>, vector<2x1x128xf32>
    tpu.vector_store %arg14[%c0_55, %c0_56, %c0_57], %61 {strides = array<i32>} : memref<2x10x128xf32, #tpu.memory_space<vmem>>, vector<2x1x128xf32>,
    %cst_58 = arith.constant 0.000000e+00 : f32
    %63 = vector.broadcast %cst_58 : f32 to vector<2x1x128xf32>
    %c0_59 = arith.constant 0 : index
    %c9_60 = arith.constant 9 : index
    %c0_61 = arith.constant 0 : index
    %64 = vector.load %arg14[%c0_59, %c9_60, %c0_61] : memref<2x10x128xf32, #tpu.memory_space<vmem>>, vector<2x1x128xf32>
    tpu.vector_store %arg14[%c0_59, %c9_60, %c0_61], %63 {strides = array<i32>} : memref<2x10x128xf32, #tpu.memory_space<vmem>>, vector<2x1x128xf32>,
    %c0_62 = arith.constant 0 : index
    %c1_63 = arith.constant 1 : index
    %c0_64 = arith.constant 0 : index
    %65 = vector.load %arg14[%c0_62, %c1_63, %c0_64] : memref<2x10x128xf32, #tpu.memory_space<vmem>>, vector<2x8x128xf32>
    tpu.vector_store %arg14[%c0_62, %c1_63, %c0_64], %60 {strides = array<i32>} : memref<2x10x128xf32, #tpu.memory_space<vmem>>, vector<2x8x128xf32>,
    %c0_65 = arith.constant 0 : index
    %c0_66 = arith.constant 0 : index
    %c0_67 = arith.constant 0 : index
    %66 = vector.load %arg14[%c0_65, %c0_66, %c0_67] : memref<2x10x128xf32, #tpu.memory_space<vmem>>, vector<2x8x128xf32>
    %67 = vector.shape_cast %66 : vector<2x8x128xf32> to vector<16x128xf32>
    %68 = arith.truncf %67 : vector<16x128xf32> to vector<16x128xbf16>
    %c0_68 = arith.constant 0 : index
    %c0_69 = arith.constant 0 : index
    %c0_70 = arith.constant 0 : index
    %69 = vector.load %arg6[%c0_68, %c0_69, %c0_70] : memref<3x128x256xbf16, #tpu.memory_space<vmem>>, vector<1x128x256xbf16>
    %70 = vector.shape_cast %69 : vector<1x128x256xbf16> to vector<128x256xbf16>
    %cst_71 = arith.constant dense<0.000000e+00> : vector<16x256xf32>
    %71 = tpu.matmul %68, %70, %cst_71 {dimension_numbers = #tpu.dot_dimension_numbers<[1], [0], [0], [1], [0, 0, 1, 1], [], []>} : vector<16x128xbf16>, vector<128x256xbf16>, vector<16x256xf32> -> vector<16x256xf32>
    %c0_72 = arith.constant 0 : index
    %c1_73 = arith.constant 1 : index
    %c0_74 = arith.constant 0 : index
    %72 = vector.load %arg14[%c0_72, %c1_73, %c0_74] : memref<2x10x128xf32, #tpu.memory_space<vmem>>, vector<2x8x128xf32>
    %73 = vector.shape_cast %72 : vector<2x8x128xf32> to vector<16x128xf32>
    %74 = arith.truncf %73 : vector<16x128xf32> to vector<16x128xbf16>
    %c1_75 = arith.constant 1 : index
    %c0_76 = arith.constant 0 : index
    %c0_77 = arith.constant 0 : index
    %75 = vector.load %arg6[%c1_75, %c0_76, %c0_77] : memref<3x128x256xbf16, #tpu.memory_space<vmem>>, vector<1x128x256xbf16>
    %76 = vector.shape_cast %75 : vector<1x128x256xbf16> to vector<128x256xbf16>
    %cst_78 = arith.constant dense<0.000000e+00> : vector<16x256xf32>
    %77 = tpu.matmul %74, %76, %cst_78 {dimension_numbers = #tpu.dot_dimension_numbers<[1], [0], [0], [1], [0, 0, 1, 1], [], []>} : vector<16x128xbf16>, vector<128x256xbf16>, vector<16x256xf32> -> vector<16x256xf32>
    %78 = arith.addf %71, %77 : vector<16x256xf32>
    %c0_79 = arith.constant 0 : index
    %c2_80 = arith.constant 2 : index
    %c0_81 = arith.constant 0 : index
    %79 = vector.load %arg14[%c0_79, %c2_80, %c0_81] : memref<2x10x128xf32, #tpu.memory_space<vmem>>, vector<2x8x128xf32>
    %80 = vector.shape_cast %79 : vector<2x8x128xf32> to vector<16x128xf32>
    %81 = arith.truncf %80 : vector<16x128xf32> to vector<16x128xbf16>
    %c2_82 = arith.constant 2 : index
    %c0_83 = arith.constant 0 : index
    %c0_84 = arith.constant 0 : index
    %82 = vector.load %arg6[%c2_82, %c0_83, %c0_84] : memref<3x128x256xbf16, #tpu.memory_space<vmem>>, vector<1x128x256xbf16>
    %83 = vector.shape_cast %82 : vector<1x128x256xbf16> to vector<128x256xbf16>
    %cst_85 = arith.constant dense<0.000000e+00> : vector<16x256xf32>
    %84 = tpu.matmul %81, %83, %cst_85 {dimension_numbers = #tpu.dot_dimension_numbers<[1], [0], [0], [1], [0, 0, 1, 1], [], []>} : vector<16x128xbf16>, vector<128x256xbf16>, vector<16x256xf32> -> vector<16x256xf32>
    %85 = arith.addf %78, %84 : vector<16x256xf32>
    %c0_86 = arith.constant 0 : index
    %c0_87 = arith.constant 0 : index
    %86 = vector.load %arg7[%c0_86, %c0_87] : memref<1x256xf32, #tpu.memory_space<vmem>>, vector<1x256xf32>
    %87 = vector.shape_cast %86 : vector<1x256xf32> to vector<256xf32>
    %88 = vector.shape_cast %87 : vector<256xf32> to vector<1x256xf32>
    %89 = vector.broadcast %88 : vector<1x256xf32> to vector<16x256xf32>
    %90 = arith.addf %85, %89 : vector<16x256xf32>
    %cst_88 = arith.constant 0.000000e+00 : f32
    %91 = vector.broadcast %cst_88 : f32 to vector<16x256xf32>
    %92 = arith.maximumf %90, %91 : vector<16x256xf32>
    %93 = vector.shape_cast %92 : vector<16x256xf32> to vector<2x8x256xf32>
    %c0_89 = arith.constant 0 : index
    %c0_90 = arith.constant 0 : index
    %c0_91 = arith.constant 0 : index
    %94 = vector.load %arg15[%c0_89, %c0_90, %c0_91] : memref<2x8x256xf32, #tpu.memory_space<vmem>>, vector<2x8x256xf32>
    tpu.vector_store %arg15[%c0_89, %c0_90, %c0_91], %93 {strides = array<i32>} : memref<2x8x256xf32, #tpu.memory_space<vmem>>, vector<2x8x256xf32>,
    %c0_92 = arith.constant 0 : index
    %c0_93 = arith.constant 0 : index
    %c0_94 = arith.constant 0 : index
    %95 = vector.load %arg15[%c0_92, %c0_93, %c0_94] : memref<2x8x256xf32, #tpu.memory_space<vmem>>, vector<2x1x256xf32>
    %96 = vector.shape_cast %95 : vector<2x1x256xf32> to vector<2x256xf32>
    %c0_95 = arith.constant 0 : index
    %c1_96 = arith.constant 1 : index
    %c0_97 = arith.constant 0 : index
    %97 = vector.load %arg15[%c0_95, %c1_96, %c0_97] : memref<2x8x256xf32, #tpu.memory_space<vmem>>, vector<2x1x256xf32>
    %98 = vector.shape_cast %97 : vector<2x1x256xf32> to vector<2x256xf32>
    %c0_98 = arith.constant 0 : index
    %c2_99 = arith.constant 2 : index
    %c0_100 = arith.constant 0 : index
    %99 = vector.load %arg15[%c0_98, %c2_99, %c0_100] : memref<2x8x256xf32, #tpu.memory_space<vmem>>, vector<2x1x256xf32>
    %100 = vector.shape_cast %99 : vector<2x1x256xf32> to vector<2x256xf32>
    %c0_101 = arith.constant 0 : index
    %c3 = arith.constant 3 : index
    %c0_102 = arith.constant 0 : index
    %101 = vector.load %arg15[%c0_101, %c3, %c0_102] : memref<2x8x256xf32, #tpu.memory_space<vmem>>, vector<2x1x256xf32>
    %102 = vector.shape_cast %101 : vector<2x1x256xf32> to vector<2x256xf32>
    %c0_103 = arith.constant 0 : index
    %c4 = arith.constant 4 : index
    %c0_104 = arith.constant 0 : index
    %103 = vector.load %arg15[%c0_103, %c4, %c0_104] : memref<2x8x256xf32, #tpu.memory_space<vmem>>, vector<2x1x256xf32>
    %104 = vector.shape_cast %103 : vector<2x1x256xf32> to vector<2x256xf32>
    %c0_105 = arith.constant 0 : index
    %c5 = arith.constant 5 : index
    %c0_106 = arith.constant 0 : index
    %105 = vector.load %arg15[%c0_105, %c5, %c0_106] : memref<2x8x256xf32, #tpu.memory_space<vmem>>, vector<2x1x256xf32>
    %106 = vector.shape_cast %105 : vector<2x1x256xf32> to vector<2x256xf32>
    %c0_107 = arith.constant 0 : index
    %c6 = arith.constant 6 : index
    %c0_108 = arith.constant 0 : index
    %107 = vector.load %arg15[%c0_107, %c6, %c0_108] : memref<2x8x256xf32, #tpu.memory_space<vmem>>, vector<2x1x256xf32>
    %108 = vector.shape_cast %107 : vector<2x1x256xf32> to vector<2x256xf32>
    %c0_109 = arith.constant 0 : index
    %c7 = arith.constant 7 : index
    %c0_110 = arith.constant 0 : index
    %109 = vector.load %arg15[%c0_109, %c7, %c0_110] : memref<2x8x256xf32, #tpu.memory_space<vmem>>, vector<2x1x256xf32>
    %110 = vector.shape_cast %109 : vector<2x1x256xf32> to vector<2x256xf32>
    %111 = tpu.concatenate %96, %98, %100, %102, %104, %106, %108, %110 in 1 : vector<2x256xf32>, vector<2x256xf32>, vector<2x256xf32>, vector<2x256xf32>, vector<2x256xf32>, vector<2x256xf32>, vector<2x256xf32>, vector<2x256xf32> -> vector<2x2048xf32>
    %112 = arith.truncf %111 : vector<2x2048xf32> to vector<2x2048xbf16>
    %c0_111 = arith.constant 0 : index
    %c0_112 = arith.constant 0 : index
    %113 = vector.load %arg8[%c0_111, %c0_112] : memref<2048x128xbf16, #tpu.memory_space<vmem>>, vector<2048x128xbf16>
    %cst_113 = arith.constant dense<0.000000e+00> : vector<2x128xf32>
    %114 = tpu.matmul %112, %113, %cst_113 {dimension_numbers = #tpu.dot_dimension_numbers<[1], [0], [0], [1], [0, 0, 1, 1], [], []>} : vector<2x2048xbf16>, vector<2048x128xbf16>, vector<2x128xf32> -> vector<2x128xf32>
    %c0_114 = arith.constant 0 : index
    %c0_115 = arith.constant 0 : index
    %115 = vector.load %arg9[%c0_114, %c0_115] : memref<1x128xf32, #tpu.memory_space<vmem>>, vector<1x128xf32>
    %116 = vector.shape_cast %115 : vector<1x128xf32> to vector<128xf32>
    %117 = vector.shape_cast %116 : vector<128xf32> to vector<1x128xf32>
    %118 = vector.broadcast %117 : vector<1x128xf32> to vector<2x128xf32>
    %119 = arith.addf %114, %118 : vector<2x128xf32>
    %cst_116 = arith.constant 0.000000e+00 : f32
    %120 = vector.broadcast %cst_116 : f32 to vector<2x128xf32>
    %121 = arith.maximumf %119, %120 : vector<2x128xf32>
    %122 = arith.truncf %121 : vector<2x128xf32> to vector<2x128xbf16>
    %c0_117 = arith.constant 0 : index
    %c0_118 = arith.constant 0 : index
    %123 = vector.load %arg10[%c0_117, %c0_118] : memref<128x128xbf16, #tpu.memory_space<vmem>>, vector<128x128xbf16>
    %cst_119 = arith.constant dense<0.000000e+00> : vector<2x128xf32>
    %124 = tpu.matmul %122, %123, %cst_119 {dimension_numbers = #tpu.dot_dimension_numbers<[1], [0], [0], [1], [0, 0, 1, 1], [], []>} : vector<2x128xbf16>, vector<128x128xbf16>, vector<2x128xf32> -> vector<2x128xf32>
    %c0_120 = arith.constant 0 : index
    %c0_121 = arith.constant 0 : index
    %125 = vector.load %arg11[%c0_120, %c0_121] : memref<1x128xf32, #tpu.memory_space<vmem>>, vector<1x128xf32>
    %126 = vector.shape_cast %125 : vector<1x128xf32> to vector<128xf32>
    %127 = vector.shape_cast %126 : vector<128xf32> to vector<1x128xf32>
    %128 = vector.broadcast %127 : vector<1x128xf32> to vector<2x128xf32>
    %129 = arith.addf %124, %128 : vector<2x128xf32>
    %c0_122 = arith.constant 0 : index
    %c0_123 = arith.constant 0 : index
    %130 = vector.load %arg12[%c0_122, %c0_123] : memref<2x128xf32, #tpu.memory_space<vmem>>, vector<2x128xf32>
    tpu.vector_store %arg12[%c0_122, %c0_123], %129 {strides = array<i32>} : memref<2x128xf32, #tpu.memory_space<vmem>>, vector<2x128xf32>,
    return
  }
  func.func @transform_0(%arg0: i32) -> (i32, i32, i32) {
    %c0_i32 = arith.constant 0 : i32
    %c0_i32_0 = arith.constant 0 : i32
    %c0_i32_1 = arith.constant 0 : i32
    return %arg0, %c0_i32, %c0_i32_0 : i32, i32, i32
  }
  func.func @transform_1(%arg0: i32) -> (i32, i32, i32) {
    %c0_i32 = arith.constant 0 : i32
    %c0_i32_0 = arith.constant 0 : i32
    %c0_i32_1 = arith.constant 0 : i32
    %c0_i32_2 = arith.constant 0 : i32
    return %c0_i32, %c0_i32_0, %c0_i32_1 : i32, i32, i32
  }
  func.func @transform_2(%arg0: i32) -> (i32, i32) {
    %c0_i32 = arith.constant 0 : i32
    %c0_i32_0 = arith.constant 0 : i32
    %c0_i32_1 = arith.constant 0 : i32
    return %c0_i32, %c0_i32_0 : i32, i32
  }
  func.func @transform_3(%arg0: i32) -> (i32, i32, i32) {
    %c0_i32 = arith.constant 0 : i32
    %c0_i32_0 = arith.constant 0 : i32
    %c0_i32_1 = arith.constant 0 : i32
    %c0_i32_2 = arith.constant 0 : i32
    return %c0_i32, %c0_i32_0, %c0_i32_1 : i32, i32, i32
  }
  func.func @transform_4(%arg0: i32) -> (i32, i32) {
    %c0_i32 = arith.constant 0 : i32
    %c0_i32_0 = arith.constant 0 : i32
    %c0_i32_1 = arith.constant 0 : i32
    return %c0_i32, %c0_i32_0 : i32, i32
  }
  func.func @transform_5(%arg0: i32) -> (i32, i32, i32) {
    %c0_i32 = arith.constant 0 : i32
    %c0_i32_0 = arith.constant 0 : i32
    %c0_i32_1 = arith.constant 0 : i32
    %c0_i32_2 = arith.constant 0 : i32
    return %c0_i32, %c0_i32_0, %c0_i32_1 : i32, i32, i32
  }
  func.func @transform_6(%arg0: i32) -> (i32, i32) {
    %c0_i32 = arith.constant 0 : i32
    %c0_i32_0 = arith.constant 0 : i32
    %c0_i32_1 = arith.constant 0 : i32
    return %c0_i32, %c0_i32_0 : i32, i32
  }
  func.func @transform_7(%arg0: i32) -> (i32, i32) {
    %c0_i32 = arith.constant 0 : i32
    %c0_i32_0 = arith.constant 0 : i32
    %c0_i32_1 = arith.constant 0 : i32
    return %c0_i32, %c0_i32_0 : i32, i32
  }
  func.func @transform_8(%arg0: i32) -> (i32, i32) {
    %c0_i32 = arith.constant 0 : i32
    %c0_i32_0 = arith.constant 0 : i32
    %c0_i32_1 = arith.constant 0 : i32
    return %c0_i32, %c0_i32_0 : i32, i32
  }
  func.func @transform_9(%arg0: i32) -> (i32, i32) {
    %c0_i32 = arith.constant 0 : i32
    %c0_i32_0 = arith.constant 0 : i32
    %c0_i32_1 = arith.constant 0 : i32
    return %c0_i32, %c0_i32_0 : i32, i32
  }
  func.func @transform_10(%arg0: i32) -> (i32, i32) {
    %c0_i32 = arith.constant 0 : i32
    %c0_i32_0 = arith.constant 0 : i32
    %c0_i32_1 = arith.constant 0 : i32
    return %c0_i32, %c0_i32_0 : i32, i32
  }
  func.func @transform_11(%arg0: i32) -> (i32, i32) {
    %c0_i32 = arith.constant 0 : i32
    %c0_i32_0 = arith.constant 0 : i32
    return %arg0, %c0_i32 : i32, i32
  }
}

</mosaic_0001>

<bundles_post_ra>
// kernel: dqn_forward.1
= control target key start
LH: loop header
LB: loop body
LE: loop exit
PB: predicated region body
PF: predicated region fallthrough
CT: control target
= control target key end

     0   :  { %16 = vsyncpa [#allocation6], 0  ;;  %s4075_s0 = inlined_call_operand.vmem [shape: f32[2,10,40], index: 0, kind: input, shape index: {}]   ;;  %s4076_s1 = inlined_call_operand.hbm [shape: bf16[3,40,64], index: 1, kind: input, shape index: {}]   ;;  %s4077_s2 = inlined_call_operand.vmem [shape: f32[1,64], index: 2, kind: input, shape index: {}]   ;;  %s4078_s3 = inlined_call_operand.hbm [shape: bf16[3,64,128], index: 3, kind: input, shape index: {}]   ;;  %s4079_s4 = inlined_call_operand.vmem [shape: f32[1,128], index: 4, kind: input, shape index: {}]   ;;  %s4080_s5 = inlined_call_operand.vmem [shape: bf16[3,128,256], index: 5, kind: input, shape index: {}]   ;;  %s4081_s6 = inlined_call_operand.vmem [shape: f32[1,256], index: 6, kind: input, shape index: {}]   ;;  %s4082_s7 = inlined_call_operand.hbm [shape: bf16[2048,128], index: 7, kind: input, shape index: {}]   ;;  %s4083_s8 = inlined_call_operand.vmem [shape: f32[1,128], index: 8, kind: input, shape index: {}]   ;;  %s4084_s9 = inlined_call_operand.hbm [shape: bf16[128,128], index: 9, kind: input, shape index: {}]   ;;  %s4085_s10 = inlined_call_operand.vmem [shape: f32[1,128], index: 10, kind: input, shape index: {}]   ;;  %s4086_s11 = inlined_call_operand.hbm [shape: f32[2,128], index: 11, kind: output, shape index: {}]  }
   0x1   :  { %17 = vsyncpa [#allocation9], 0 }
   0x2   :  { %18 = vsyncpa [#allocation12], 0 }
   0x3   :  { %19 = vsyncpa [#allocation7], 0  ;;  %s3682_s17 = smov [#allocation8]   ;;  %s3683_s19 = smov [#allocation5]  }
   0x4   :  { %s41_s18 = sshll.u32 %s3682_s17, 4  ;;  %s27_s20 = sshll.u32 %s3683_s19, 4  ;;  %s42_s18 = int_to_ptr.vmem [resolvable:$true] %s41_s18  ;;  %s28_s20 = int_to_ptr.vmem [resolvable:$true] %s27_s20 }
   0x5   :  { %s3582_s21 = scalar_lea.vmem %s42_s18, 1536  ;;  %p3587_p1 = scmp.lt.s32.totalorder %s42_s18, %s42_s18 }
   0x6   :  { %p3583_p0 = scmp.ne.s32.totalorder %s42_s18, %s3582_s21  ;;  %p3588_p2 = scmp.lt.s32.totalorder %s3582_s21, %s3582_s21 }
   0x8   :  { %p3589_p3 = por %p3588_p2, %p3587_p1 }
   0xa   :  { %p3590_p4 = pnand %p3589_p3, %p3583_p0 }
   0xc   :  { %3593 = shalt.err (!%p3590_p4)
}
   0xd   :  { %s3684_s22 = smov 64   ;;  %s3685_s23 = smov 4  }
   0xe   :  { %47 = dma.hbm_to_vmem [thread:$0]  %s4078_s3, 1536, %s42_s18, [#allocation9], %s3684_s22, %s3684_s22, %s3685_s23  }
   0xf   :  { %s3602_s26 = scalar_lea.vmem %s28_s20, 960  ;;  %p3607_p6 = scmp.lt.s32.totalorder %s28_s20, %s28_s20 }
  0x10   :  { %p3603_p5 = scmp.ne.s32.totalorder %s28_s20, %s3602_s26  ;;  %p3608_p7 = scmp.lt.s32.totalorder %s3602_s26, %s3602_s26 }
  0x12   :  { %p3609_p8 = por %p3608_p7, %p3607_p6 }
  0x14   :  { %p3610_p9 = pnand %p3609_p8, %p3603_p5 }
  0x16   :  { %3613 = shalt.err (!%p3610_p9)
}
  0x17   :  { %33 = dma.hbm_to_vmem [thread:$0]  %s4076_s1, 960, %s28_s20, [#allocation6], %s3684_s22, %s3684_s22, %s3685_s23  }
  0x18   :  { %s3686_s29 = smov [#allocation10]   ;;  %s3687_s12 = smov [#allocation11]  }
  0x19   :  { %s59_s30 = sshll.u32 %s3686_s29, 4  ;;  %s73_s13 = sshll.u32 %s3687_s12, 4  ;;  %s60_s30 = int_to_ptr.vmem [resolvable:$true] %s59_s30  ;;  %s74_s13 = int_to_ptr.vmem [resolvable:$true] %s73_s13 }
  0x1a   :  { %s3622_s3 = scalar_lea.vmem %s60_s30, 16384  ;;  %p3627_p11 = scmp.lt.s32.totalorder %s60_s30, %s60_s30 }
  0x1b   :  { %p3623_p10 = scmp.ne.s32.totalorder %s60_s30, %s3622_s3  ;;  %p3628_p12 = scmp.lt.s32.totalorder %s3622_s3, %s3622_s3 }
  0x1d   :  { %p3629_p13 = por %p3628_p12, %p3627_p11 }
  0x1f   :  { %p3630_p0 = pnand %p3629_p13, %p3623_p10 }
  0x21   :  { %3633 = shalt.err (!%p3630_p0)
}
  0x22   :  { %65 = dma.hbm_to_vmem [thread:$0]  %s4082_s7, 16384, %s60_s30, [#allocation9], %s3684_s22, %s3684_s22, %s3685_s23  }
  0x23   :  { %s3642_s1 = scalar_lea.vmem %s74_s13, 1024  ;;  %p3647_p2 = scmp.lt.s32.totalorder %s74_s13, %s74_s13 }
  0x24   :  { %p3643_p1 = scmp.ne.s32.totalorder %s74_s13, %s3642_s1  ;;  %p3648_p3 = scmp.lt.s32.totalorder %s3642_s1, %s3642_s1 }
  0x26   :  { %p3649_p4 = por %p3648_p3, %p3647_p2 }
  0x28   :  { %p3650_p5 = pnand %p3649_p4, %p3643_p1 }
  0x2a   :  { %3653 = shalt.err (!%p3650_p5)
}
  0x2b   :  { %79 = dma.hbm_to_vmem [thread:$0]  %s4084_s9, 1024, %s74_s13, [#allocation12], %s3684_s22, %s3684_s22, %s3685_s23  }
  0x2c   :  { %3674 = dma.done.wait [#allocation6], 960  }
  0x2d   :  { %3675 = vsyncadd [#allocation6], 4294966336 }
  0x2e   :  { %3676 = dma.done.wait [#allocation9], 17920  }
  0x2f   :  { %3677 = vsyncadd [#allocation9], 4294949376 }
  0x30   :  { %3678 = dma.done.wait [#allocation12], 1024  }
  0x31   :  { %3679 = vsyncadd [#allocation12], 4294966272  ;;  %v3688_v0 = vmov 0.0   ;;  %vm3689_vm0 = vmmov 0   ;;  %vm131_vm1 = vcmask 1043456   ;;  %v3347_v5 = vld [vmem:[#allocation5 + $0x1c] sm:$0xff]  }
  0x32   :  { %3248 = vmatprep.subr.bf16.mxu0 %v3688_v0  ;;  %582 = vst [vmem:[#allocation3] sm:$0x1] %v3688_v0  ;;  %583 = vst [vmem:[#allocation3 + $0x10] sm:$0x1] %v3688_v0  ;;  %3258 = vmatprep.subr.bf16.mxu1 %v3688_v0  ;;  %v3345_v1 = vld [vmem:[#allocation5 + $0x24] ss:$0 sps:$4 sm:$0xff]  }
  0x33   :  { %584 = vst [vmem:[#allocation3 + $0x9] sm:$0x1] %v3688_v0  ;;  %585 = vst [vmem:[#allocation3 + $0x19] sm:$0x1] %v3688_v0  ;;  %3254 = vmatprep.mubr.msk.bf16.mxu0 %vm3689_vm0, %v3688_v0  ;;  %3264 = vmatprep.mubr.msk.bf16.mxu1 %vm3689_vm0, %v3688_v0  ;;  %v3346_v2 = vld [vmem:[#allocation5 + $0x10] ss:$0 sps:$4 sm:$0xff]  }
  0x34   :  { %v133_v3 = vsel %vm131_vm1, %v3345_v1, 0  ;;  %v195_v4 = vsel %vm131_vm1, %v3346_v2, 0  ;;  %v3348_v6 = vld [vmem:[#allocation5 + $0x8] sm:$0xff]   ;;  %v3349_v7 = vld [vmem:[#allocation5 + $0x14] sm:$0xff]   ;;  %v3350_v9 = vld [vmem:[#allocation5] sm:$0xff]   ;;  %vm127_vm2 = vcmask 326656  }
  0x35   :  { %3249 = vmatpush3.bf16.msra.mxu0 %v133_v3  ;;  %3259 = vmatpush3.bf16.msra.mxu1 %v195_v4  ;;  %v103_v8 = vld [vmem:[%s4075_s0 + $0x1] sm:$0xff]  ;;  %v104_v10 = vld [vmem:[%s4075_s0 + $0x11] sm:$0xff]  ;;  %vm322_vm3 = vcmask 516096   ;;  %v2801_v40 = vld [vmem:[%s4077_s2] ss:$0 sm:$0xff]  ;;  %vm327_vm4 = vcmask 523264  }
  0x36   :  { %3250 = vmatprep.subr.bf16.mxu0 %v3688_v0  ;;  %3260 = vmatprep.subr.bf16.mxu1 %v3688_v0  ;;  %v95_v11 = vld [vmem:[%s4075_s0] sm:$0xff]  ;;  %v3351_v12 = vld [vmem:[#allocation5 + $0x38] ss:$0 sps:$4 sm:$0xff]   ;;  %v96_v13 = vld [vmem:[%s4075_s0 + $0x10] sm:$0xff]  ;;  %v105_v15 = vpack.c.bf16 %v104_v10, %v103_v8  ;;  %323 = vst.msk [vmem:[#allocation2] sm:$0x1] %vm322_vm3, %v3688_v0 }
  0x37   :  { %v266_v14 = vsel %vm131_vm1, %v3351_v12, 0  ;;  %v97_v16 = vpack.c.bf16 %v96_v13, %v95_v11  ;;  %v3352_v17 = vld [vmem:[#allocation5 + $0x30] sm:$0xff]   ;;  %v3353_v18 = vld [vmem:[#allocation5 + $0x28] sm:$0xff]   ;;  %324 = vst.msk [vmem:[#allocation2 + $0x10] sm:$0x1] %vm322_vm3, %v3688_v0  ;;  %v3360_v28 = vld [vmem:[#allocation8 + $0x20] sm:$0xff]  }
  0x38   :  { %v238_v19 = vld [vmem:[%s4075_s0 + $0x2] sm:$0xff]  ;;  %v239_v20 = vld [vmem:[%s4075_s0 + $0x12] sm:$0xff]  ;;  %325 = vst.msk [vmem:[#allocation2 + $0x9] sm:$0x1] %vm322_vm3, %v3688_v0  ;;  %326 = vst.msk [vmem:[#allocation2 + $0x19] sm:$0x1] %vm322_vm3, %v3688_v0 }
  0x39   :  { %3251 = vmatpush3.bf16.msra.mxu0 %v3347_v5  ;;  %3261 = vmatpush3.bf16.msra.mxu1 %v3348_v6  ;;  %v240_v21 = vpack.c.bf16 %v239_v20, %v238_v19  ;;  %v3354_v22 = vld [vmem:[#allocation8 + $0x38] sm:$0xff]   ;;  %v3356_v24 = vld [vmem:[#allocation8 + $0x30] sm:$0xff]   ;;  %v3358_v26 = vld [vmem:[#allocation8 + $0x28] sm:$0xff]   ;;  %s3692_s28 = smov [#allocation13]  }
  0x3a   :  { %3252 = vmatprep.subr.bf16.mxu0 %v3688_v0  ;;  %3262 = vmatprep.subr.bf16.mxu1 %v3688_v0  ;;  %v3355_v23 = vld [vmem:[#allocation8 + $0x18] sm:$0xff]   ;;  %v3357_v25 = vld [vmem:[#allocation8 + $0x10] sm:$0xff]   ;;  %v3359_v27 = vld [vmem:[#allocation8 + $0x8] sm:$0xff]   ;;  %s2778_s2 = sshll.u32 %s3692_s28, 4  ;;  %s2779_s2 = int_to_ptr.vmem [resolvable:$true] %s2778_s2 }
  0x3b   :  { %v3361_v29 = vld [vmem:[#allocation8] sm:$0xff]   ;;  %v3362_v52 = vld [vmem:[#allocation8 + $0x58] sm:$0xff]   ;;  %v3363_v58 = vld [vmem:[#allocation8 + $0x50] sm:$0xff]   ;;  %s3654_s29 = scalar_lea.vmem %s2779_s2, 32  ;;  %p3659_p7 = scmp.lt.s32.totalorder %s2779_s2, %s2779_s2 }
  0x3c   :  { %v3364_v59 = vld [vmem:[#allocation8 + $0x48] sm:$0xff]   ;;  %v3365_v60 = vld [vmem:[#allocation8 + $0x40] sm:$0xff]   ;;  %v3366_v2 = vld [vmem:[%s4080_s5 + $0xf0] ss:$8 sps:$4 sm:$0xff]   ;;  %p3655_p6 = scmp.ne.s32.totalorder %s2779_s2, %s3654_s29  ;;  %p3660_p8 = scmp.lt.s32.totalorder %s3654_s29, %s3654_s29 }
  0x3d   :  { %3253 = vmatpush3.bf16.msra.mxu0 %v3349_v7  ;;  %3263 = vmatpush3.bf16.msra.mxu1 %v3350_v9  ;;  %v3368_v1 = vld [vmem:[%s4080_s5 + $0xf4] ss:$8 sps:$4 sm:$0xff]   ;;  %v3374_v3 = vld [vmem:[%s4080_s5 + $0xe4] ss:$8 sps:$4 sm:$0xff]   ;;  %v3372_v4 = vld [vmem:[%s4080_s5 + $0xe0] ss:$8 sps:$4 sm:$0xff]  }
  0x3e   :  { %3268 = vmatprep.subr.bf16.mxu0 %v3688_v0  ;;  %3278 = vmatprep.subr.bf16.mxu1 %v3688_v0  ;;  %v3380_v5 = vld [vmem:[%s4080_s5 + $0xd4] ss:$8 sps:$4 sm:$0xff]   ;;  %v3378_v7 = vld [vmem:[%s4080_s5 + $0xd0] ss:$8 sps:$4 sm:$0xff]   ;;  %v3375_v9 = vld [vmem:[%s4080_s5 + $0x60] ss:$8 sps:$4 sm:$0xff]   ;;  %p3661_p9 = por %p3660_p8, %p3659_p7 }
  0x3f   :  { %v3371_v6 = vld [vmem:[%s4080_s5 + $0x74] ss:$8 sps:$4 sm:$0xff]   ;;  %v3369_v8 = vld [vmem:[%s4080_s5 + $0x70] ss:$8 sps:$4 sm:$0xff]   ;;  %v3377_v10 = vld [vmem:[%s4080_s5 + $0x64] ss:$8 sps:$4 sm:$0xff]  }
  0x40   :  { %3255 = vmatmul.mubr.msk.bf16.vlgmr.msra.gmra.mxu0 %vm127_vm2, %v105_v15  ;;  %3265 = vmatmul.mubr.msk.bf16.vlgmr.msra.gmra.mxu1 %vm127_vm2, %v97_v16  ;;  %v3383_v11 = vld [vmem:[%s4080_s5 + $0x54] ss:$8 sps:$4 sm:$0xff]   ;;  %v3384_v12 = vld [vmem:[%s4080_s5 + $0xc0] ss:$8 sps:$4 sm:$0xff]   ;;  %v3386_v13 = vld [vmem:[%s4080_s5 + $0xc4] ss:$8 sps:$4 sm:$0xff]   ;;  %p3662_p10 = pnand %p3661_p9, %p3655_p6 }
  0x41   :  { %3269 = vmatpush3.bf16.msra.mxu0 %v266_v14  ;;  %3274 = vmatprep.mubr.msk.bf16.mxu0 %vm3689_vm0, %v3688_v0  ;;  %v3381_v14 = vld [vmem:[%s4080_s5 + $0x50] ss:$8 sps:$4 sm:$0xff]   ;;  %v3392_v15 = vld [vmem:[%s4080_s5 + $0xb4] ss:$8 sps:$4 sm:$0xff]   ;;  %v3396_v19 = vld [vmem:[%s4080_s5 + $0xa0] ss:$8 sps:$4 sm:$0xff]  }
  0x42   :  { %3270 = vmatprep.subr.bf16.mxu0 %v3688_v0  ;;  %3286 = vmatprep.mubr.msk.bf16.mxu1 %vm3689_vm0, %v3688_v0  ;;  %v3390_v16 = vld [vmem:[%s4080_s5 + $0xb0] ss:$8 sps:$4 sm:$0xff]   ;;  %v3387_v20 = vld [vmem:[%s4080_s5 + $0x40] ss:$8 sps:$4 sm:$0xff]  }
  0x43   :  { %3279 = vmatpush3.bf16.msra.mxu1 %v3354_v22  ;;  %v3395_v22 = vld [vmem:[%s4080_s5 + $0x34] ss:$8 sps:$4 sm:$0xff]  }
  0x44   :  { %3280 = vmatprep.subr.bf16.mxu1 %v3688_v0 }
  0x45   :  { %3271 = vmatpush3.bf16.msra.mxu0 %v3352_v17  ;;  %v3398_v17 = vld [vmem:[%s4080_s5 + $0xa4] ss:$8 sps:$4 sm:$0xff]  }
  0x46   :  { %3272 = vmatprep.subr.bf16.mxu0 %v3688_v0 }
  0x47   :  { %3281 = vmatpush3.bf16.msra.mxu1 %v3356_v24  ;;  %v3393_v24 = vld [vmem:[%s4080_s5 + $0x30] ss:$8 sps:$4 sm:$0xff]  }
  0x48   :  { %3282 = vmatprep.subr.bf16.mxu1 %v3688_v0 }
  0x49   :  { %3273 = vmatpush3.bf16.msra.mxu0 %v3353_v18  ;;  %v3389_v18 = vld [vmem:[%s4080_s5 + $0x44] ss:$8 sps:$4 sm:$0xff]  }
  0x4a   :  { %3290 = vmatprep.subr.bf16.mxu0 %v3688_v0 }
  0x4b   :  { %3283 = vmatpush3.bf16.msra.mxu1 %v3358_v26  ;;  %v3401_v26 = vld [vmem:[%s4080_s5 + $0x24] ss:$8 sps:$4 sm:$0xff]  }
  0x4c   :  { %3275 = vmatmul.mubr.msk.bf16.vlgmr.msra.gmra.mxu0 %vm127_vm2, %v240_v21  ;;  %3284 = vmatprep.subr.bf16.mxu1 %v3688_v0  ;;  %v3404_v21 = vld [vmem:[%s4080_s5 + $0x94] ss:$8 sps:$4 sm:$0xff]  }
  0x4d   :  { %3298 = vmatprep.mubr.msk.bf16.mxu0 %vm3689_vm0, %v3688_v0  ;;  %3291 = vmatpush3.bf16.msra.mxu0 %v3355_v23  ;;  %v3402_v23 = vld [vmem:[%s4080_s5 + $0x90] ss:$8 sps:$4 sm:$0xff]  }
  0x4e   :  { %3292 = vmatprep.subr.bf16.mxu0 %v3688_v0 }
  0x4f   :  { %3285 = vmatpush3.bf16.msra.mxu1 %v3360_v28  ;;  %v3399_v28 = vld [vmem:[%s4080_s5 + $0x20] ss:$8 sps:$4 sm:$0xff]  }
  0x50   :  { %3302 = vmatprep.subr.bf16.mxu1 %v3688_v0 }
  0x51   :  { %3293 = vmatpush3.bf16.msra.mxu0 %v3357_v25  ;;  %v3410_v25 = vld [vmem:[%s4080_s5 + $0x84] ss:$8 sps:$4 sm:$0xff]  }
  0x52   :  { %3294 = vmatprep.subr.bf16.mxu0 %v3688_v0 }
  0x55   :  { %3295 = vmatpush3.bf16.msra.mxu0 %v3359_v27  ;;  %v3408_v27 = vld [vmem:[%s4080_s5 + $0x80] ss:$8 sps:$4 sm:$0xff]  }
  0x56   :  { %3296 = vmatprep.subr.bf16.mxu0 %v3688_v0 }
  0x59   :  { %3297 = vmatpush3.bf16.msra.mxu0 %v3361_v29  ;;  %v3416_v29 = vld [vmem:[%s4080_s5 + $0x174] ss:$8 sps:$4 sm:$0xff]  }
  0x5a   :  { %707 = vmatprep.subr.bf16.mxu0 %v3368_v1 }
 0x100   :  { %v169_v30 = vpop.f32.mrf.mxu0  ;;  %v231_v31 = vpop.f32.mrf.mxu1 }
 0x101   :  { %v232_v38 = vadd.f32 %v231_v31, %v169_v30  ;;  %v3405_v30 = vld [vmem:[%s4080_s5 + $0x10] ss:$8 sps:$4 sm:$0xff]   ;;  %v3407_v31 = vld [vmem:[%s4080_s5 + $0x14] ss:$8 sps:$4 sm:$0xff]  }
 0x102   :  { %v3256_v32 = vpop.f32.mrf.mxu0  ;;  %v3266_v33 = vpop.f32.mrf.mxu1 }
 0x103   :  { %v3413_v32 = vld [vmem:[%s4080_s5 + $0x4] ss:$8 sps:$4 sm:$0xff]   ;;  %v3690_v33 = vmov 0  }
 0x104   :  { %v172_v34 = vpop.f32.mrf.mxu0  ;;  %v234_v35 = vpop.f32.mrf.mxu1 }
 0x105   :  { %v235_v43 = vadd.f32 %v234_v35, %v172_v34  ;;  %v3411_v34 = vld [vmem:[%s4080_s5] ss:$8 sps:$4 sm:$0xff]  }
 0x106   :  { %v3257_v36 = vpop.f32.mrf.mxu0  ;;  %v3267_v37 = vpop.f32.mrf.mxu1 }
 0x10c   :  { %v302_v39 = vpop.f32.mrf.mxu0 }
 0x10d   :  { %v309_v41 = vadd.f32 %v302_v39, %v232_v38 }
 0x10e   :  { %v3276_v42 = vpop.f32.mrf.mxu0 }
 0x10f   :  { %v318_v44 = vadd.f32 %v2801_v40, %v309_v41 }
 0x110   :  { %v305_v45 = vpop.f32.mrf.mxu0 }
 0x111   :  { %v320_v46 = vmax.f32 %v318_v44, 0.0  ;;  %v310_v47 = vadd.f32 %v305_v45, %v235_v43  ;;  %v2817_v45 = vld [vmem:[%s4079_s4] ss:$0 sm:$0xff] }
 0x112   :  { %v3277_v48 = vpop.f32.mrf.mxu0 }
 0x113   :  { %v319_v49 = vadd.f32 %v2801_v40, %v310_v47  ;;  %328 = vst.msk [vmem:[#allocation2 + $0x1] sm:$0xff] %vm327_vm4, %v320_v46 }
 0x115   :  { %v321_v50 = vmax.f32 %v319_v49, 0.0 }
 0x117   :  { %329 = vst.msk [vmem:[#allocation2 + $0x11] sm:$0xff] %vm327_vm4, %v321_v50 }
 0x11a   :  { %v341_v51 = vld [vmem:[#allocation2 + $0x1] sm:$0xff] }
 0x11b   :  { %v330_v54 = vld [vmem:[#allocation2] sm:$0xff] }
 0x11c   :  { %v489_v62 = vld [vmem:[#allocation2 + $0x2] sm:$0xff] }
 0x11e   :  { %v342_v53 = vld [vmem:[#allocation2 + $0x11] sm:$0xff] }
 0x11f   :  { %v331_v55 = vld [vmem:[#allocation2 + $0x10] sm:$0xff]  ;;  %v343_v56 = vpack.c.bf16 %v342_v53, %v341_v51 }
 0x120   :  { %v332_v57 = vpack.c.bf16 %v331_v55, %v330_v54  ;;  %v490_v61 = vld [vmem:[#allocation2 + $0x12] sm:$0xff] }
 0x121   :  { %3287 = vmatmul.mubr.msk.bf16.vlgmr.msra.gmra.mxu1 %vm327_vm4, %v343_v56  ;;  %v491_v63 = vpack.c.bf16 %v490_v61, %v489_v62  ;;  %v3414_v56 = vld [vmem:[%s4080_s5 + $0x170] ss:$8 sps:$4 sm:$0xff]  }
 0x122   :  { %3299 = vmatmul.mubr.msk.bf16.vlgmr.msra.gmra.mxu0 %vm327_vm4, %v332_v57  ;;  %3303 = vmatpush3.bf16.msra.mxu1 %v3362_v52 }
 0x123   :  { %3310 = vmatprep.mubr.msk.bf16.mxu1 %vm3689_vm0, %v3688_v0  ;;  %3304 = vmatprep.subr.bf16.mxu1 %v3688_v0 }
 0x124   :  { %708 = vmatpush1.bf16.msra.mxu0 %v3366_v2  ;;  %739 = vmatprep.mubr.bf16.mxu0 %v3690_v33  ;;  %v3425_v2 = vld [vmem:[%s4080_s5 + $0x144] ss:$8 sps:$4 sm:$0xff]  }
 0x125   :  { %709 = vmatprep.subr.bf16.mxu0 %v3374_v3  ;;  %v3423_v3 = vld [vmem:[%s4080_s5 + $0x140] ss:$8 sps:$4 sm:$0xff]  }
 0x126   :  { %3305 = vmatpush3.bf16.msra.mxu1 %v3363_v58  ;;  %v3419_v58 = vld [vmem:[%s4080_s5 + $0x164] ss:$8 sps:$4 sm:$0xff]  }
 0x127   :  { %3306 = vmatprep.subr.bf16.mxu1 %v3688_v0 }
 0x128   :  { %710 = vmatpush1.bf16.msra.mxu0 %v3372_v4  ;;  %v3428_v4 = vld [vmem:[%s4080_s5 + $0x134] ss:$8 sps:$4 sm:$0xff]  }
 0x129   :  { %711 = vmatprep.subr.bf16.mxu0 %v3380_v5  ;;  %v3426_v5 = vld [vmem:[%s4080_s5 + $0x130] ss:$8 sps:$4 sm:$0xff]  }
 0x12a   :  { %3307 = vmatpush3.bf16.msra.mxu1 %v3364_v59  ;;  %v3417_v59 = vld [vmem:[%s4080_s5 + $0x160] ss:$8 sps:$4 sm:$0xff]  }
 0x12b   :  { %3308 = vmatprep.subr.bf16.mxu1 %v3688_v0 }
 0x12c   :  { %712 = vmatpush1.bf16.msra.mxu0 %v3378_v7  ;;  %v3429_v7 = vld [vmem:[%s4080_s5 + $0x120] ss:$8 sps:$4 sm:$0xff]  }
 0x12d   :  { %713 = vmatprep.subr.bf16.mxu0 %v3386_v13 }
 0x12e   :  { %3309 = vmatpush3.bf16.msra.mxu1 %v3365_v60  ;;  %v3422_v60 = vld [vmem:[%s4080_s5 + $0x154] ss:$8 sps:$4 sm:$0xff]  }
 0x12f   :  { %830 = vmatprep.subr.bf16.mxu1 %v3371_v6  ;;  %v3431_v6 = vld [vmem:[%s4080_s5 + $0x124] ss:$8 sps:$4 sm:$0xff]  }
 0x130   :  { %714 = vmatpush1.bf16.msra.mxu0 %v3384_v12 }
 0x131   :  { %3311 = vmatmul.mubr.msk.bf16.vlgmr.msra.gmra.mxu1 %vm327_vm4, %v491_v63  ;;  %715 = vmatprep.subr.bf16.mxu0 %v3392_v15  ;;  %v3420_v63 = vld [vmem:[%s4080_s5 + $0x150] ss:$8 sps:$4 sm:$0xff]  }
 0x132   :  { %831 = vmatpush1.bf16.msra.mxu1 %v3369_v8  ;;  %862 = vmatprep.mubr.bf16.mxu1 %v3690_v33  ;;  %v3434_v8 = vld [vmem:[%s4080_s5 + $0x114] ss:$8 sps:$4 sm:$0xff]  }
 0x133   :  { %832 = vmatprep.subr.bf16.mxu1 %v3377_v10  ;;  %v3437_v10 = vld [vmem:[%s4080_s5 + $0x104] ss:$8 sps:$4 sm:$0xff]   ;;  %v3438_v15 = vld [vmem:[#allocation10 + $0x78] sm:$0xff]  }
 0x134   :  { %716 = vmatpush1.bf16.msra.mxu0 %v3390_v16  ;;  %v3439_v16 = vld [vmem:[#allocation10 + $0xf8] sm:$0xff]  }
 0x135   :  { %717 = vmatprep.subr.bf16.mxu0 %v3398_v17  ;;  %v3440_v17 = vld [vmem:[#allocation10 + $0x38] sm:$0xff]  }
 0x136   :  { %833 = vmatpush1.bf16.msra.mxu1 %v3375_v9  ;;  %v3432_v9 = vld [vmem:[%s4080_s5 + $0x110] ss:$8 sps:$4 sm:$0xff]  }
 0x137   :  { %834 = vmatprep.subr.bf16.mxu1 %v3383_v11  ;;  %v3435_v11 = vld [vmem:[%s4080_s5 + $0x100] ss:$8 sps:$4 sm:$0xff]  }
 0x138   :  { %718 = vmatpush1.bf16.msra.mxu0 %v3396_v19  ;;  %v3442_v19 = vld [vmem:[#allocation10 + $0x70] sm:$0xff]  }
 0x139   :  { %719 = vmatprep.subr.bf16.mxu0 %v3404_v21  ;;  %v3444_v21 = vld [vmem:[#allocation10 + $0x30] sm:$0xff]  }
 0x13a   :  { %835 = vmatpush1.bf16.msra.mxu1 %v3381_v14 }
 0x13b   :  { %836 = vmatprep.subr.bf16.mxu1 %v3389_v18  ;;  %v3441_v18 = vld [vmem:[#allocation10 + $0xb8] sm:$0xff]  }
 0x13c   :  { %720 = vmatpush1.bf16.msra.mxu0 %v3402_v23  ;;  %v3446_v23 = vld [vmem:[#allocation10 + $0x68] sm:$0xff]  }
 0x13d   :  { %721 = vmatprep.subr.bf16.mxu0 %v3410_v25  ;;  %v3448_v25 = vld [vmem:[#allocation10 + $0x28] sm:$0xff]  }
 0x13e   :  { %837 = vmatpush1.bf16.msra.mxu1 %v3387_v20  ;;  %v3443_v20 = vld [vmem:[#allocation10 + $0xf0] sm:$0xff]  }
 0x13f   :  { %838 = vmatprep.subr.bf16.mxu1 %v3395_v22  ;;  %v3445_v22 = vld [vmem:[#allocation10 + $0xb0] sm:$0xff]  }
 0x140   :  { %722 = vmatpush1.bf16.msra.mxu0 %v3408_v27  ;;  %v3450_v27 = vld [vmem:[#allocation10 + $0x60] sm:$0xff]  }
 0x141   :  { %973 = vmatprep.subr.bf16.mxu0 %v3416_v29  ;;  %v3452_v29 = vld [vmem:[#allocation10 + $0x20] sm:$0xff]  }
 0x142   :  { %839 = vmatpush1.bf16.msra.mxu1 %v3393_v24  ;;  %v3447_v24 = vld [vmem:[#allocation10 + $0xe8] sm:$0xff]  }
 0x143   :  { %840 = vmatprep.subr.bf16.mxu1 %v3401_v26  ;;  %v3449_v26 = vld [vmem:[#allocation10 + $0xa8] sm:$0xff]  }
 0x146   :  { %841 = vmatpush1.bf16.msra.mxu1 %v3399_v28  ;;  %v3451_v28 = vld [vmem:[#allocation10 + $0xe0] sm:$0xff]  }
 0x147   :  { %842 = vmatprep.subr.bf16.mxu1 %v3407_v31  ;;  %v3454_v31 = vld [vmem:[#allocation10 + $0x58] sm:$0xff]  }
 0x14a   :  { %843 = vmatpush1.bf16.msra.mxu1 %v3405_v30  ;;  %v3453_v30 = vld [vmem:[#allocation10 + $0xa0] sm:$0xff]  }
 0x14b   :  { %844 = vmatprep.subr.bf16.mxu1 %v3413_v32  ;;  %v3455_v32 = vld [vmem:[#allocation10 + $0xd8] sm:$0xff]  }
 0x14e   :  { %845 = vmatpush1.bf16.msra.mxu1 %v3411_v34  ;;  %v3457_v34 = vld [vmem:[#allocation10 + $0x98] sm:$0xff]  }
 0x14f   :  { %3063 = vmatprep.subr.bf16.mxu1 %v3438_v15 }
 0x1e1   :  { %v414_v35 = vpop.f32.mrf.mxu1 }
 0x1e2   :  { %v482_v36 = vpop.f32.mrf.mxu0 }
 0x1e3   :  { %v3288_v37 = vpop.f32.mrf.mxu1  ;;  %v483_v43 = vadd.f32 %v482_v36, %v414_v35  ;;  %v3458_v35 = vld [vmem:[#allocation10 + $0x50] sm:$0xff]  }
 0x1e4   :  { %v3300_v38 = vpop.f32.mrf.mxu0  ;;  %v3459_v36 = vld [vmem:[#allocation10 + $0xd0] sm:$0xff]  }
 0x1e5   :  { %v417_v39 = vpop.f32.mrf.mxu1  ;;  %v3460_v37 = vld [vmem:[#allocation10 + $0x10] sm:$0xff]  }
 0x1e6   :  { %v485_v40 = vpop.f32.mrf.mxu0  ;;  %v3461_v38 = vld [vmem:[#allocation10 + $0x90] sm:$0xff]  }
 0x1e7   :  { %v3289_v41 = vpop.f32.mrf.mxu1  ;;  %v486_v48 = vadd.f32 %v485_v40, %v417_v39  ;;  %v3462_v39 = vld [vmem:[#allocation10 + $0x48] sm:$0xff]  }
 0x1e8   :  { %v3301_v42 = vpop.f32.mrf.mxu0  ;;  %v3463_v40 = vld [vmem:[#allocation10 + $0xc8] sm:$0xff]  }
 0x1e9   :  { %v3464_v41 = vld [vmem:[#allocation10 + $0x8] sm:$0xff]  }
 0x1ea   :  { %v3465_v42 = vld [vmem:[#allocation10 + $0x88] sm:$0xff]  }
 0x1f1   :  { %v562_v44 = vpop.f32.mrf.mxu1 }
 0x1f2   :  { %v569_v46 = vadd.f32 %v562_v44, %v483_v43  ;;  %v3466_v43 = vld [vmem:[#allocation10 + $0x40] sm:$0xff]  }
 0x1f3   :  { %v3312_v47 = vpop.f32.mrf.mxu1  ;;  %v3467_v44 = vld [vmem:[#allocation10 + $0xc0] sm:$0xff]  }
 0x1f4   :  { %v578_v49 = vadd.f32 %v2817_v45, %v569_v46  ;;  %v3469_v46 = vld [vmem:[#allocation10 + $0x80] sm:$0xff]   ;;  %v3470_v47 = vld [vmem:[#allocation10 + $0x178] sm:$0xff]  }
 0x1f5   :  { %v565_v50 = vpop.f32.mrf.mxu1 }
 0x1f6   :  { %v580_v51 = vmax.f32 %v578_v49, 0.0  ;;  %v570_v52 = vadd.f32 %v565_v50, %v486_v48  ;;  %v3471_v48 = vld [vmem:[#allocation10 + $0x1f8] sm:$0xff]   ;;  %v1022_v50 = vlaneseq }
 0x1f7   :  { %v3313_v53 = vpop.f32.mrf.mxu1 }
 0x1f8   :  { %586 = vst [vmem:[#allocation3 + $0x1] sm:$0xff] %v580_v51  ;;  %v579_v54 = vadd.f32 %v2817_v45, %v570_v52  ;;  %v3468_v45 = vld [vmem:[#allocation10] sm:$0xff]   ;;  %v1023_v53 = vshrl.u32 %v1022_v50, 7 }
 0x1fa   :  { %v581_v55 = vmax.f32 %v579_v54, 0.0 }
 0x1fc   :  { %587 = vst [vmem:[#allocation3 + $0x11] sm:$0xff] %v581_v55  ;;  %v609_v57 = vpack.c.bf16 %v581_v55, %v580_v51 }
 0x1fe   :  { %740 = vmatmul.mubr.bf16.vlgmr.msra.gmra.mxu0 %v609_v57  ;;  %v1020_v57 = vld [vmem:[%s4081_s6] sm:$0x3] }
 0x1ff   :  { %974 = vmatpush1.bf16.msra.mxu0 %v3414_v56  ;;  %1005 = vmatprep.mubr.bf16.mxu0 %v3690_v33  ;;  %v588_v61 = vld [vmem:[#allocation3] sm:$0xff]  ;;  %v3456_v33 = vld [vmem:[#allocation10 + $0x18] sm:$0xff]   ;;  %v1024_v56 = vsub.s32 0, %v1023_v53 }
 0x200   :  { %975 = vmatprep.subr.bf16.mxu0 %v3419_v58  ;;  %v873_v13 = vld [vmem:[#allocation3 + $0x2] sm:$0xff]  ;;  %v1028_v58 = vsub.s32 1, %v1023_v53 }
 0x203   :  { %v589_v62 = vld [vmem:[#allocation3 + $0x10] sm:$0xff]  ;;  %976 = vmatpush1.bf16.msra.mxu0 %v3417_v59 }
 0x204   :  { %v590_v1 = vpack.c.bf16 %v589_v62, %v588_v61  ;;  %977 = vmatprep.subr.bf16.mxu0 %v3422_v60  ;;  %v874_v12 = vld [vmem:[#allocation3 + $0x12] sm:$0xff]  ;;  %v1025_v62 = vrot.slane %v1020_v57, %v1024_v56 }
 0x205   :  { %v875_v14 = vpack.c.bf16 %v874_v12, %v873_v13 }
 0x206   :  { %863 = vmatmul.mubr.bf16.vlgmr.msra.gmra.mxu1 %v590_v1 }
 0x207   :  { %978 = vmatpush1.bf16.msra.mxu0 %v3420_v63  ;;  %3064 = vmatpush3.bf16.msra.mxu1 %v3440_v17 }
 0x208   :  { %979 = vmatprep.subr.bf16.mxu0 %v3425_v2  ;;  %3065 = vmatprep.subr.bf16.mxu1 %v3442_v19 }
 0x20b   :  { %980 = vmatpush1.bf16.msra.mxu0 %v3423_v3  ;;  %3066 = vmatpush3.bf16.msra.mxu1 %v3444_v21  ;;  %v1029_v3 = vrot.slane %v1020_v57, %v1028_v58  ;;  %v3474_v57 = vld [vmem:[#allocation10 + $0x170] sm:$0xff]  }
 0x20c   :  { %981 = vmatprep.subr.bf16.mxu0 %v3428_v4  ;;  %3067 = vmatprep.subr.bf16.mxu1 %v3446_v23  ;;  %v3475_v58 = vld [vmem:[#allocation10 + $0x1f0] sm:$0xff]  }
 0x20f   :  { %982 = vmatpush1.bf16.msra.mxu0 %v3426_v5  ;;  %3068 = vmatpush3.bf16.msra.mxu1 %v3448_v25 }
 0x210   :  { %983 = vmatprep.subr.bf16.mxu0 %v3431_v6  ;;  %3069 = vmatprep.subr.bf16.mxu1 %v3450_v27 }
 0x213   :  { %984 = vmatpush1.bf16.msra.mxu0 %v3429_v7  ;;  %3070 = vmatpush3.bf16.msra.mxu1 %v3452_v29 }
 0x214   :  { %985 = vmatprep.subr.bf16.mxu0 %v3434_v8  ;;  %3071 = vmatprep.subr.bf16.mxu1 %v3454_v31 }
 0x217   :  { %986 = vmatpush1.bf16.msra.mxu0 %v3432_v9  ;;  %3072 = vmatpush3.bf16.msra.mxu1 %v3456_v33 }
 0x218   :  { %987 = vmatprep.subr.bf16.mxu0 %v3437_v10  ;;  %3073 = vmatprep.subr.bf16.mxu1 %v3458_v35 }
 0x21b   :  { %988 = vmatpush1.bf16.msra.mxu0 %v3435_v11  ;;  %3074 = vmatpush3.bf16.msra.mxu1 %v3460_v37 }
 0x21c   :  { %3085 = vmatprep.subr.bf16.mxu0 %v3439_v16  ;;  %3075 = vmatprep.subr.bf16.mxu1 %v3462_v39 }
 0x21e   :  { %1006 = vmatmul.mubr.bf16.vlgmr.msra.gmra.mxu0 %v875_v14 }
 0x21f   :  { %3086 = vmatpush3.bf16.msra.mxu0 %v3441_v18  ;;  %3076 = vmatpush3.bf16.msra.mxu1 %v3464_v41 }
 0x220   :  { %3087 = vmatprep.subr.bf16.mxu0 %v3443_v20  ;;  %3077 = vmatprep.subr.bf16.mxu1 %v3466_v43  ;;  %v3691_v20 = vmov 1966171168  }
 0x221   :  { %v1079_v21 = vunpack.c.l.s4 %v3691_v20  ;;  %v3492_v20 = vld [vmem:[#allocation10 + $0x110] sm:$0xff]  }
 0x223   :  { %3088 = vmatpush3.bf16.msra.mxu0 %v3445_v22  ;;  %3078 = vmatpush3.bf16.msra.mxu1 %v3468_v45  ;;  %v1080_v23 = vunpack.c.0.s8 %v1079_v21  ;;  %v3493_v21 = vld [vmem:[#allocation10 + $0x190] sm:$0xff]  }
 0x224   :  { %3089 = vmatprep.subr.bf16.mxu0 %v3447_v24  ;;  %3107 = vmatprep.subr.bf16.mxu1 %v3470_v47 }
 0x227   :  { %3090 = vmatpush3.bf16.msra.mxu0 %v3449_v26  ;;  %v4000_v26 = vsub.s32 %v1080_v23, %v1023_v53  ;;  %v3472_v53 = vld [vmem:[#allocation10 + $0x138] sm:$0xff]   ;;  %v3495_v23 = vld [vmem:[#allocation10 + $0x1c8] sm:$0xff]  }
 0x228   :  { %3091 = vmatprep.subr.bf16.mxu0 %v3451_v28 }
 0x22b   :  { %3092 = vmatpush3.bf16.msra.mxu0 %v3453_v30 }
 0x22c   :  { %3093 = vmatprep.subr.bf16.mxu0 %v3455_v32 }
 0x22f   :  { %3094 = vmatpush3.bf16.msra.mxu0 %v3457_v34 }
 0x230   :  { %3095 = vmatprep.subr.bf16.mxu0 %v3459_v36 }
 0x233   :  { %3096 = vmatpush3.bf16.msra.mxu0 %v3461_v38 }
 0x234   :  { %3097 = vmatprep.subr.bf16.mxu0 %v3463_v40 }
 0x237   :  { %3098 = vmatpush3.bf16.msra.mxu0 %v3465_v42 }
 0x238   :  { %3099 = vmatprep.subr.bf16.mxu0 %v3467_v44 }
 0x23b   :  { %3100 = vmatpush3.bf16.msra.mxu0 %v3469_v46 }
 0x23c   :  { %3129 = vmatprep.subr.bf16.mxu0 %v3471_v48 }
 0x2be   :  { %v741_v49 = vpop.f32.mrf.mxu0 }
 0x2c0   :  { %v743_v52 = vpop.f32.mrf.mxu0 }
 0x2c2   :  { %v745_v55 = vpop.f32.mrf.mxu0 }
 0x2c4   :  { %v747_v60 = vpop.f32.mrf.mxu0 }
 0x2c6   :  { %v864_v51 = vpop.f32.mrf.mxu1 }
 0x2c7   :  { %v865_v61 = vadd.f32 %v864_v51, %v741_v49 }
 0x2c8   :  { %v866_v54 = vpop.f32.mrf.mxu1 }
 0x2c9   :  { %v867_v1 = vadd.f32 %v866_v54, %v743_v52  ;;  %v3473_v54 = vld [vmem:[#allocation10 + $0x1b8] sm:$0xff]  }
 0x2ca   :  { %v868_v59 = vpop.f32.mrf.mxu1 }
 0x2cb   :  { %v869_v6 = vadd.f32 %v868_v59, %v745_v55 }
 0x2cc   :  { %v870_v4 = vpop.f32.mrf.mxu1 }
 0x2cd   :  { %v871_v10 = vadd.f32 %v870_v4, %v747_v60  ;;  %v3482_v4 = vld [vmem:[#allocation10 + $0x160] sm:$0xff]  }
 0x2de   :  { %v1007_v63 = vpop.f32.mrf.mxu0 }
 0x2df   :  { %v1016_v2 = vadd.f32 %v1007_v63, %v865_v61  ;;  %v3476_v61 = vld [vmem:[#allocation10 + $0x130] sm:$0xff]   ;;  %v3478_v63 = vld [vmem:[#allocation10 + $0x168] sm:$0xff]  }
 0x2e0   :  { %v1009_v5 = vpop.f32.mrf.mxu0 }
 0x2e1   :  { %v1032_v7 = vadd.f32 %v1025_v62, %v1016_v2  ;;  %v1017_v8 = vadd.f32 %v1009_v5, %v867_v1  ;;  %v3479_v1 = vld [vmem:[#allocation10 + $0x1e8] sm:$0xff]   ;;  %v3483_v5 = vld [vmem:[#allocation10 + $0x1e0] sm:$0xff]  }
 0x2e2   :  { %v1011_v9 = vpop.f32.mrf.mxu0  ;;  %v3480_v2 = vld [vmem:[#allocation10 + $0x128] sm:$0xff]  }
 0x2e3   :  { %v1036_v11 = vmax.f32 %v1032_v7, 0.0  ;;  %v1033_v12 = vadd.f32 %v1029_v3, %v1017_v8  ;;  %v1018_v13 = vadd.f32 %v1011_v9, %v869_v6  ;;  %v3484_v6 = vld [vmem:[#allocation10 + $0x120] sm:$0xff]   ;;  %v3486_v8 = vld [vmem:[#allocation10 + $0x158] sm:$0xff]  }
 0x2e4   :  { %v1013_v14 = vpop.f32.mrf.mxu0  ;;  %v3485_v7 = vld [vmem:[#allocation10 + $0x1a0] sm:$0xff]   ;;  %v3487_v9 = vld [vmem:[#allocation10 + $0x1d8] sm:$0xff]  }
 0x2e5   :  { %1040 = vst [vmem:[#allocation4] sm:$0xff] %v1036_v11  ;;  %v1037_v15 = vmax.f32 %v1033_v12, 0.0  ;;  %v1034_v16 = vadd.f32 %v1025_v62, %v1018_v13  ;;  %v1019_v17 = vadd.f32 %v1013_v14, %v871_v10  ;;  %v3477_v62 = vld [vmem:[#allocation10 + $0x1b0] sm:$0xff]   ;;  %v3488_v11 = vld [vmem:[#allocation10 + $0x118] sm:$0xff]  }
 0x2e6   :  { %v3489_v12 = vld [vmem:[#allocation10 + $0x198] sm:$0xff]   ;;  %v3490_v14 = vld [vmem:[#allocation10 + $0x150] sm:$0xff]  }
 0x2e7   :  { %1041 = vst [vmem:[#allocation4 + $0x8] sm:$0xff] %v1037_v15  ;;  %v1038_v18 = vmax.f32 %v1034_v16, 0.0  ;;  %v1035_v19 = vadd.f32 %v1029_v3, %v1019_v17  ;;  %v3481_v3 = vld [vmem:[#allocation10 + $0x1a8] sm:$0xff]   ;;  %v3491_v15 = vld [vmem:[#allocation10 + $0x1d0] sm:$0xff]  }
 0x2e9   :  { %1042 = vst [vmem:[#allocation4 + $0x10] sm:$0xff] %v1038_v18  ;;  %v1039_v22 = vmax.f32 %v1035_v19, 0.0 }
 0x2eb   :  { %1043 = vst [vmem:[#allocation4 + $0x18] sm:$0xff] %v1039_v22  ;;  %v3494_v22 = vld [vmem:[#allocation10 + $0x148] sm:$0xff]  }
 0x2ee   :  { %v1044_v24 = vld [vmem:[#allocation4] ss:$8 sm:$0x3]  ;;  %v1048_v25 = vld [vmem:[#allocation4 + $0x1] ss:$8 sm:$0x3] }
 0x2ef   :  { %v1052_v27 = vld [vmem:[#allocation4 + $0x2] ss:$8 sm:$0x3]  ;;  %v1056_v28 = vld [vmem:[#allocation4 + $0x3] ss:$8 sm:$0x3] }
 0x2f0   :  { %v1060_v16 = vld [vmem:[#allocation4 + $0x4] ss:$8 sm:$0x3]  ;;  %v1064_v18 = vld [vmem:[#allocation4 + $0x5] ss:$8 sm:$0x3] }
 0x2f2   :  { %v1046_v29 = vld [vmem:[#allocation4 + $0x10] ss:$8 sm:$0x3]  ;;  %v1050_v30 = vld [vmem:[#allocation4 + $0x11] ss:$8 sm:$0x3] }
 0x2f3   :  { %v1077_v31 = vcombine.low %v1044_v24, %v1046_v29  ;;  %v1104_v32 = vcombine.low %v1048_v25, %v1050_v30  ;;  %v1054_v33 = vld [vmem:[#allocation4 + $0x12] ss:$8 sm:$0x3]  ;;  %v1058_v34 = vld [vmem:[#allocation4 + $0x13] ss:$8 sm:$0x3] }
 0x2f4   :  { %v1131_v35 = vcombine.low %v1052_v27, %v1054_v33  ;;  %v1158_v36 = vcombine.low %v1056_v28, %v1058_v34  ;;  %v1062_v10 = vld [vmem:[#allocation4 + $0x14] ss:$8 sm:$0x3]  ;;  %v1066_v13 = vld [vmem:[#allocation4 + $0x15] ss:$8 sm:$0x3] }
 0x2f5   :  { %v1084_v37 = vrot.slane %v1077_v31, %v4000_v26  ;;  %v1111_v38 = vrot.slane %v1104_v32, %v4000_v26  ;;  %v1185_v17 = vcombine.low %v1060_v16, %v1062_v10  ;;  %v1212_v19 = vcombine.low %v1064_v18, %v1066_v13  ;;  %v3496_v27 = vld [vmem:[#allocation10 + $0x108] sm:$0xff]   ;;  %v3498_v29 = vld [vmem:[#allocation10 + $0x140] sm:$0xff]  }
 0x2f6   :  { %v4005_v39 = vrot.slane %v1131_v35, %v4000_v26  ;;  %v4008_v40 = vrot.slane %v1158_v36, %v4000_v26  ;;  %v3497_v28 = vld [vmem:[#allocation10 + $0x188] sm:$0xff]   ;;  %v3499_v30 = vld [vmem:[#allocation10 + $0x1c0] sm:$0xff]  }
 0x2f7   :  { %v1085_v41 = vcombine.high %v1084_v37, %v1084_v37  ;;  %v1112_v42 = vcombine.high %v1111_v38, %v1111_v38  ;;  %v1092_v43 = vrot.slane %v1084_v37, %v4000_v26  ;;  %v1119_v44 = vrot.slane %v1111_v38, %v4000_v26  ;;  %v3500_v33 = vld [vmem:[#allocation10 + $0x100] sm:$0xff]   ;;  %v3502_v37 = vld [vmem:[#allocation10 + $0x278] sm:$0xff]   ;;  %v3526_v10 = vld [vmem:[#allocation10 + $0x248] sm:$0xff]  }
 0x2f8   :  { %v1139_v45 = vcombine.high %v4005_v39, %v4005_v39  ;;  %v1166_v46 = vcombine.high %v4008_v40, %v4008_v40  ;;  %v4021_v24 = vrot.slane %v1185_v17, %v4000_v26  ;;  %v4024_v25 = vrot.slane %v1212_v19, %v4000_v26  ;;  %v3501_v34 = vld [vmem:[#allocation10 + $0x180] sm:$0xff]   ;;  %v3503_v38 = vld [vmem:[#allocation10 + $0x2f8] sm:$0xff]   ;;  %v3528_v13 = vld [vmem:[#allocation10 + $0x208] sm:$0xff]  }
 0x2f9   :  { %v1099_v47 = vrot.slane %v1085_v41, %v4000_v26  ;;  %v1126_v48 = vrot.slane %v1112_v42, %v4000_v26  ;;  %v1291_v55 = vpack.c.bf16 %v1092_v43, %v1092_v43  ;;  %v1293_v56 = vpack.c.bf16 %v1119_v44, %v1119_v44  ;;  %v3504_v43 = vld [vmem:[#allocation10 + $0x238] sm:$0xff]   ;;  %v3530_v16 = vld [vmem:[#allocation10 + $0x240] sm:$0xff]  }
 0x2fa   :  { %v1153_v49 = vrot.slane %v1139_v45, %v4000_v26  ;;  %v1180_v50 = vrot.slane %v1166_v46, %v4000_v26  ;;  %v1193_v31 = vcombine.high %v4021_v24, %v4021_v24  ;;  %v1220_v32 = vcombine.high %v4024_v25, %v4024_v25  ;;  %v3505_v46 = vld [vmem:[#allocation10 + $0x2b8] sm:$0xff]   ;;  %v3531_v17 = vld [vmem:[#allocation10 + $0x2c0] sm:$0xff]  }
 0x2fb   :  { %v1292_v51 = vpack.c.bf16 %v1099_v47, %v1099_v47  ;;  %v1294_v52 = vpack.c.bf16 %v1126_v48, %v1126_v48  ;;  %v1146_v35 = vrot.slane %v4005_v39, %v4000_v26  ;;  %v1173_v36 = vrot.slane %v4008_v40, %v4000_v26  ;;  %v3506_v48 = vld [vmem:[#allocation10 + $0x270] sm:$0xff]   ;;  %v3532_v19 = vld [vmem:[#allocation10 + $0x200] sm:$0xff]  }
 0x2fc   :  { %v1296_v59 = vpack.c.bf16 %v1153_v49, %v1153_v49  ;;  %v1298_v60 = vpack.c.bf16 %v1180_v50, %v1180_v50  ;;  %v1207_v41 = vrot.slane %v1193_v31, %v4000_v26  ;;  %v1234_v42 = vrot.slane %v1220_v32, %v4000_v26  ;;  %v3507_v39 = vld [vmem:[#allocation10 + $0x2f0] sm:$0xff]  }
 0x2fd   :  { %2370 = vmatprep.mubr.bf16.mxu1 %v1292_v51  ;;  %2410 = vmatprep.mubr.bf16.mxu0 %v1294_v52  ;;  %v1295_v44 = vpack.c.bf16 %v1146_v35, %v1146_v35  ;;  %v1297_v45 = vpack.c.bf16 %v1173_v36, %v1173_v36  ;;  %v3508_v49 = vld [vmem:[#allocation10 + $0x230] sm:$0xff]   ;;  %v3510_v51 = vld [vmem:[#allocation10 + $0x268] sm:$0xff]  }
 0x2fe   :  { %2371 = vmatmul.mubr.bf16.vlgmr.msra.gmra.mxu1 %v1291_v55  ;;  %2411 = vmatmul.mubr.bf16.vlgmr.msra.gmra.mxu0 %v1293_v56  ;;  %v1300_v47 = vpack.c.bf16 %v1207_v41, %v1207_v41  ;;  %v1302_v40 = vpack.c.bf16 %v1234_v42, %v1234_v42  ;;  %v3509_v50 = vld [vmem:[#allocation10 + $0x2b0] sm:$0xff]   ;;  %v3511_v52 = vld [vmem:[#allocation10 + $0x2e8] sm:$0xff]   ;;  %v3514_v55 = vld [vmem:[#allocation10 + $0x260] sm:$0xff]  }
 0x2ff   :  { %3108 = vmatpush3.bf16.msra.mxu1 %v3472_v53  ;;  %3130 = vmatpush3.bf16.msra.mxu0 %v3473_v54  ;;  %v3512_v53 = vld [vmem:[#allocation10 + $0x228] sm:$0xff]   ;;  %v3515_v56 = vld [vmem:[#allocation10 + $0x2e0] sm:$0xff]   ;;  %v3538_v35 = vld [vmem:[#allocation10 + $0x370] sm:$0xff]  }
 0x300   :  { %2450 = vmatprep.mubr.bf16.mxu1 %v1296_v59  ;;  %2490 = vmatprep.mubr.bf16.mxu0 %v1298_v60  ;;  %v3513_v54 = vld [vmem:[#allocation10 + $0x2a8] sm:$0xff]   ;;  %v3518_v59 = vld [vmem:[#allocation10 + $0x258] sm:$0xff]   ;;  %v3539_v36 = vld [vmem:[#allocation10 + $0x3f0] sm:$0xff]  }
 0x301   :  { %3109 = vmatprep.subr.bf16.mxu1 %v3474_v57  ;;  %3131 = vmatprep.subr.bf16.mxu0 %v3475_v58  ;;  %v3516_v57 = vld [vmem:[#allocation10 + $0x220] sm:$0xff]   ;;  %v3519_v60 = vld [vmem:[#allocation10 + $0x2d8] sm:$0xff]   ;;  %v3542_v41 = vld [vmem:[#allocation10 + $0x368] sm:$0xff]  }
 0x302   :  { %v3517_v58 = vld [vmem:[#allocation10 + $0x2a0] sm:$0xff]   ;;  %v3543_v42 = vld [vmem:[#allocation10 + $0x3e8] sm:$0xff]  }
 0x303   :  { %3110 = vmatpush3.bf16.msra.mxu1 %v3476_v61  ;;  %3132 = vmatpush3.bf16.msra.mxu0 %v3477_v62  ;;  %v3520_v61 = vld [vmem:[#allocation10 + $0x218] sm:$0xff]  }
 0x304   :  { %3111 = vmatprep.subr.bf16.mxu1 %v3478_v63  ;;  %3133 = vmatprep.subr.bf16.mxu0 %v3479_v1  ;;  %v1070_v62 = vld [vmem:[#allocation4 + $0x16] ss:$8 sm:$0x3]  ;;  %v3522_v1 = vld [vmem:[#allocation10 + $0x250] sm:$0xff]  }
 0x305   :  { %v3521_v63 = vld [vmem:[#allocation10 + $0x298] sm:$0xff]  }
 0x307   :  { %3112 = vmatpush3.bf16.msra.mxu1 %v3480_v2  ;;  %3134 = vmatpush3.bf16.msra.mxu0 %v3481_v3  ;;  %v1074_v2 = vld [vmem:[#allocation4 + $0x17] ss:$8 sm:$0x3]  ;;  %v3523_v3 = vld [vmem:[#allocation10 + $0x2d0] sm:$0xff]  }
 0x308   :  { %3113 = vmatprep.subr.bf16.mxu1 %v3482_v4  ;;  %3135 = vmatprep.subr.bf16.mxu0 %v3483_v5  ;;  %v1068_v4 = vld [vmem:[#allocation4 + $0x6] ss:$8 sm:$0x3] }
 0x309   :  { %v1239_v5 = vcombine.low %v1068_v4, %v1070_v62  ;;  %v3565_v62 = vld [vmem:[#allocation10 + $0x380] sm:$0xff]   ;;  %v3566_v4 = vld [vmem:[#allocation11 + $0x38] sm:$0xff]  }
 0x30b   :  { %3114 = vmatpush3.bf16.msra.mxu1 %v3484_v6  ;;  %3136 = vmatpush3.bf16.msra.mxu0 %v3485_v7  ;;  %v1072_v6 = vld [vmem:[#allocation4 + $0x7] ss:$8 sm:$0x3] }
 0x30c   :  { %3115 = vmatprep.subr.bf16.mxu1 %v3486_v8  ;;  %3137 = vmatprep.subr.bf16.mxu0 %v3487_v9  ;;  %v3524_v7 = vld [vmem:[#allocation10 + $0x210] sm:$0xff]   ;;  %v1266_v8 = vcombine.low %v1072_v6, %v1074_v2  ;;  %v3568_v6 = vld [vmem:[#allocation11 + $0x28] sm:$0xff]  }
 0x30d   :  { %v3525_v9 = vld [vmem:[#allocation10 + $0x290] sm:$0xff]  }
 0x30f   :  { %3116 = vmatpush3.bf16.msra.mxu1 %v3488_v11  ;;  %3138 = vmatpush3.bf16.msra.mxu0 %v3489_v12  ;;  %v3527_v11 = vld [vmem:[#allocation10 + $0x2c8] sm:$0xff]   ;;  %v4037_v12 = vrot.slane %v1239_v5, %v4000_v26  ;;  %v3567_v5 = vld [vmem:[#allocation11 + $0x30] sm:$0xff]  }
 0x310   :  { %3117 = vmatprep.subr.bf16.mxu1 %v3490_v14  ;;  %3139 = vmatprep.subr.bf16.mxu0 %v3491_v15  ;;  %v4040_v14 = vrot.slane %v1266_v8, %v4000_v26  ;;  %v3529_v15 = vld [vmem:[#allocation10 + $0x288] sm:$0xff]   ;;  %v3571_v8 = vld [vmem:[#allocation11 + $0x10] sm:$0xff]  }
 0x311   :  { %v1247_v18 = vcombine.high %v4037_v12, %v4037_v12 }
 0x313   :  { %3118 = vmatpush3.bf16.msra.mxu1 %v3492_v20  ;;  %3140 = vmatpush3.bf16.msra.mxu0 %v3493_v21  ;;  %v1274_v20 = vcombine.high %v4040_v14, %v4040_v14  ;;  %v3533_v21 = vld [vmem:[#allocation10 + $0x280] sm:$0xff]  }
 0x314   :  { %3119 = vmatprep.subr.bf16.mxu1 %v3494_v22  ;;  %3141 = vmatprep.subr.bf16.mxu0 %v3495_v23  ;;  %v1200_v22 = vrot.slane %v4021_v24, %v4000_v26  ;;  %v3534_v23 = vld [vmem:[#allocation10 + $0x378] sm:$0xff]  }
 0x315   :  { %v1288_v31 = vrot.slane %v1274_v20, %v4000_v26 }
 0x316   :  { %v1299_v32 = vpack.c.bf16 %v1200_v22, %v1200_v22 }
 0x317   :  { %3120 = vmatpush3.bf16.msra.mxu1 %v3496_v27  ;;  %3142 = vmatpush3.bf16.msra.mxu0 %v3497_v28  ;;  %v1227_v27 = vrot.slane %v4024_v25, %v4000_v26  ;;  %v3535_v28 = vld [vmem:[#allocation10 + $0x3f8] sm:$0xff]   ;;  %v1306_v25 = vpack.c.bf16 %v1288_v31, %v1288_v31 }
 0x318   :  { %3121 = vmatprep.subr.bf16.mxu1 %v3498_v29  ;;  %3143 = vmatprep.subr.bf16.mxu0 %v3499_v30  ;;  %v1261_v29 = vrot.slane %v1247_v18, %v4000_v26  ;;  %v3536_v30 = vld [vmem:[#allocation10 + $0x338] sm:$0xff]  }
 0x31a   :  { %v1304_v24 = vpack.c.bf16 %v1261_v29, %v1261_v29 }
 0x31b   :  { %3122 = vmatpush3.bf16.msra.mxu1 %v3500_v33  ;;  %3144 = vmatpush3.bf16.msra.mxu0 %v3501_v34  ;;  %v3537_v33 = vld [vmem:[#allocation10 + $0x3b8] sm:$0xff]   ;;  %v1301_v34 = vpack.c.bf16 %v1227_v27, %v1227_v27 }
 0x31c   :  { %3151 = vmatprep.subr.bf16.mxu1 %v3502_v37  ;;  %3173 = vmatprep.subr.bf16.mxu0 %v3503_v38  ;;  %v3540_v37 = vld [vmem:[#allocation10 + $0x330] sm:$0xff]  }
 0x31d   :  { %v3541_v38 = vld [vmem:[#allocation10 + $0x3b0] sm:$0xff]  }
 0x31e   :  { %2451 = vmatmul.mubr.bf16.vlgmr.msra.gmra.mxu1 %v1295_v44  ;;  %2491 = vmatmul.mubr.bf16.vlgmr.msra.gmra.mxu0 %v1297_v45  ;;  %v3545_v44 = vld [vmem:[#allocation10 + $0x3a8] sm:$0xff]   ;;  %v3546_v45 = vld [vmem:[#allocation10 + $0x360] sm:$0xff]  }
 0x31f   :  { %3152 = vmatpush3.bf16.msra.mxu1 %v3504_v43  ;;  %2530 = vmatprep.mubr.bf16.mxu1 %v1300_v47  ;;  %v3544_v43 = vld [vmem:[#allocation10 + $0x328] sm:$0xff]   ;;  %v3548_v47 = vld [vmem:[#allocation10 + $0x320] sm:$0xff]  }
 0x320   :  { %3174 = vmatpush3.bf16.msra.mxu0 %v3505_v46  ;;  %2570 = vmatprep.mubr.bf16.mxu0 %v1302_v40  ;;  %v3547_v46 = vld [vmem:[#allocation10 + $0x3e0] sm:$0xff]   ;;  %v3551_v40 = vld [vmem:[#allocation10 + $0x3d8] sm:$0xff]  }
 0x321   :  { %3153 = vmatprep.subr.bf16.mxu1 %v3506_v48  ;;  %3175 = vmatprep.subr.bf16.mxu0 %v3507_v39  ;;  %v3549_v48 = vld [vmem:[#allocation10 + $0x3a0] sm:$0xff]   ;;  %v3550_v39 = vld [vmem:[#allocation10 + $0x358] sm:$0xff]  }
 0x323   :  { %3154 = vmatpush3.bf16.msra.mxu1 %v3508_v49  ;;  %v3552_v49 = vld [vmem:[#allocation10 + $0x318] sm:$0xff]  }
 0x324   :  { %3176 = vmatpush3.bf16.msra.mxu0 %v3509_v50  ;;  %3155 = vmatprep.subr.bf16.mxu1 %v3510_v51  ;;  %v3553_v50 = vld [vmem:[#allocation10 + $0x398] sm:$0xff]   ;;  %v3554_v51 = vld [vmem:[#allocation10 + $0x350] sm:$0xff]  }
 0x325   :  { %3177 = vmatprep.subr.bf16.mxu0 %v3511_v52  ;;  %v3555_v52 = vld [vmem:[#allocation10 + $0x3d0] sm:$0xff]  }
 0x327   :  { %3156 = vmatpush3.bf16.msra.mxu1 %v3512_v53  ;;  %v3556_v53 = vld [vmem:[#allocation10 + $0x310] sm:$0xff]  }
 0x328   :  { %3178 = vmatpush3.bf16.msra.mxu0 %v3513_v54  ;;  %3157 = vmatprep.subr.bf16.mxu1 %v3514_v55  ;;  %v3557_v54 = vld [vmem:[#allocation10 + $0x390] sm:$0xff]   ;;  %v3558_v55 = vld [vmem:[#allocation10 + $0x348] sm:$0xff]  }
 0x329   :  { %3179 = vmatprep.subr.bf16.mxu0 %v3515_v56  ;;  %v3559_v56 = vld [vmem:[#allocation10 + $0x3c8] sm:$0xff]  }
 0x32b   :  { %3158 = vmatpush3.bf16.msra.mxu1 %v3516_v57  ;;  %v3560_v57 = vld [vmem:[#allocation10 + $0x308] sm:$0xff]  }
 0x32c   :  { %3180 = vmatpush3.bf16.msra.mxu0 %v3517_v58  ;;  %3159 = vmatprep.subr.bf16.mxu1 %v3518_v59  ;;  %v3561_v58 = vld [vmem:[#allocation10 + $0x388] sm:$0xff]   ;;  %v3562_v59 = vld [vmem:[#allocation10 + $0x340] sm:$0xff]  }
 0x32d   :  { %3181 = vmatprep.subr.bf16.mxu0 %v3519_v60  ;;  %v3563_v60 = vld [vmem:[#allocation10 + $0x3c0] sm:$0xff]  }
 0x32f   :  { %3160 = vmatpush3.bf16.msra.mxu1 %v3520_v61  ;;  %v3564_v61 = vld [vmem:[#allocation10 + $0x300] sm:$0xff]  }
 0x330   :  { %3182 = vmatpush3.bf16.msra.mxu0 %v3521_v63  ;;  %3161 = vmatprep.subr.bf16.mxu1 %v3522_v1  ;;  %v1254_v63 = vrot.slane %v4037_v12, %v4000_v26  ;;  %v1281_v1 = vrot.slane %v4040_v14, %v4000_v26  ;;  %v3569_v26 = vld [vmem:[#allocation11 + $0x20] sm:$0xff]  }
 0x331   :  { %3183 = vmatprep.subr.bf16.mxu0 %v3523_v3 }
 0x332   :  { %v1303_v2 = vpack.c.bf16 %v1254_v63, %v1254_v63  ;;  %v1305_v3 = vpack.c.bf16 %v1281_v1, %v1281_v1 }
 0x333   :  { %3162 = vmatpush3.bf16.msra.mxu1 %v3524_v7  ;;  %v3570_v7 = vld [vmem:[#allocation11 + $0x18] sm:$0xff]  }
 0x334   :  { %3184 = vmatpush3.bf16.msra.mxu0 %v3525_v9  ;;  %3163 = vmatprep.subr.bf16.mxu1 %v3526_v10  ;;  %v3572_v9 = vld [vmem:[#allocation11 + $0x8] sm:$0xff]   ;;  %v3573_v10 = vld [vmem:[#allocation11] sm:$0xff]  }
 0x335   :  { %3185 = vmatprep.subr.bf16.mxu0 %v3527_v11 }
 0x337   :  { %3164 = vmatpush3.bf16.msra.mxu1 %v3528_v13  ;;  %v2898_v13 = vld [vmem:[%s4083_s8] ss:$0 sm:$0xff] }
 0x338   :  { %3186 = vmatpush3.bf16.msra.mxu0 %v3529_v15  ;;  %3165 = vmatprep.subr.bf16.mxu1 %v3530_v16 }
 0x339   :  { %3187 = vmatprep.subr.bf16.mxu0 %v3531_v17 }
 0x33b   :  { %3166 = vmatpush3.bf16.msra.mxu1 %v3532_v19 }
 0x33c   :  { %3188 = vmatpush3.bf16.msra.mxu0 %v3533_v21  ;;  %3195 = vmatprep.subr.bf16.mxu1 %v3534_v23 }
 0x33d   :  { %3217 = vmatprep.subr.bf16.mxu0 %v3535_v28 }
 0x33e   :  { %2531 = vmatmul.mubr.bf16.vlgmr.msra.gmra.mxu1 %v1299_v32 }
 0x33f   :  { %2571 = vmatmul.mubr.bf16.vlgmr.msra.gmra.mxu0 %v1301_v34  ;;  %3196 = vmatpush3.bf16.msra.mxu1 %v3536_v30 }
 0x340   :  { %2610 = vmatprep.mubr.bf16.mxu1 %v1304_v24  ;;  %3218 = vmatpush3.bf16.msra.mxu0 %v3537_v33 }
 0x341   :  { %2650 = vmatprep.mubr.bf16.mxu0 %v1306_v25  ;;  %3197 = vmatprep.subr.bf16.mxu1 %v3538_v35 }
 0x342   :  { %3219 = vmatprep.subr.bf16.mxu0 %v3539_v36 }
 0x343   :  { %3198 = vmatpush3.bf16.msra.mxu1 %v3540_v37 }
 0x344   :  { %3220 = vmatpush3.bf16.msra.mxu0 %v3541_v38  ;;  %3199 = vmatprep.subr.bf16.mxu1 %v3542_v41 }
 0x345   :  { %3221 = vmatprep.subr.bf16.mxu0 %v3543_v42 }
 0x347   :  { %3200 = vmatpush3.bf16.msra.mxu1 %v3544_v43 }
 0x348   :  { %3222 = vmatpush3.bf16.msra.mxu0 %v3545_v44  ;;  %3201 = vmatprep.subr.bf16.mxu1 %v3546_v45 }
 0x349   :  { %3223 = vmatprep.subr.bf16.mxu0 %v3547_v46 }
 0x34b   :  { %3202 = vmatpush3.bf16.msra.mxu1 %v3548_v47 }
 0x34c   :  { %3224 = vmatpush3.bf16.msra.mxu0 %v3549_v48  ;;  %3203 = vmatprep.subr.bf16.mxu1 %v3550_v39 }
 0x34d   :  { %3225 = vmatprep.subr.bf16.mxu0 %v3551_v40 }
 0x34f   :  { %3204 = vmatpush3.bf16.msra.mxu1 %v3552_v49 }
 0x350   :  { %3226 = vmatpush3.bf16.msra.mxu0 %v3553_v50  ;;  %3205 = vmatprep.subr.bf16.mxu1 %v3554_v51 }
 0x351   :  { %3227 = vmatprep.subr.bf16.mxu0 %v3555_v52 }
 0x353   :  { %3206 = vmatpush3.bf16.msra.mxu1 %v3556_v53 }
 0x354   :  { %3228 = vmatpush3.bf16.msra.mxu0 %v3557_v54  ;;  %3207 = vmatprep.subr.bf16.mxu1 %v3558_v55 }
 0x355   :  { %3229 = vmatprep.subr.bf16.mxu0 %v3559_v56 }
 0x357   :  { %3208 = vmatpush3.bf16.msra.mxu1 %v3560_v57 }
 0x358   :  { %3230 = vmatpush3.bf16.msra.mxu0 %v3561_v58  ;;  %3209 = vmatprep.subr.bf16.mxu1 %v3562_v59 }
 0x359   :  { %3231 = vmatprep.subr.bf16.mxu0 %v3563_v60 }
 0x35b   :  { %3210 = vmatpush3.bf16.msra.mxu1 %v3564_v61 }
 0x35c   :  { %3232 = vmatpush3.bf16.msra.mxu0 %v3565_v62  ;;  %3314 = vmatprep.subr.bf16.mxu1 %v3688_v0  ;;  %v3027_v62 = vld [vmem:[%s4085_s10] ss:$0 sm:$0xff] }
 0x35e   :  { %2611 = vmatmul.mubr.bf16.vlgmr.msra.gmra.mxu1 %v1303_v2 }
 0x35f   :  { %2651 = vmatmul.mubr.bf16.vlgmr.msra.gmra.mxu0 %v1305_v3  ;;  %3330 = vmatprep.mubr.msk.bf16.mxu1 %vm3689_vm0, %v3688_v0 }
 0x360   :  { %3315 = vmatpush3.bf16.msra.mxu1 %v3566_v4 }
 0x361   :  { %3316 = vmatprep.subr.bf16.mxu1 %v3688_v0 }
 0x364   :  { %3317 = vmatpush3.bf16.msra.mxu1 %v3567_v5 }
 0x365   :  { %3318 = vmatprep.subr.bf16.mxu1 %v3688_v0 }
 0x368   :  { %3319 = vmatpush3.bf16.msra.mxu1 %v3568_v6 }
 0x369   :  { %3320 = vmatprep.subr.bf16.mxu1 %v3688_v0 }
 0x36c   :  { %3321 = vmatpush3.bf16.msra.mxu1 %v3569_v26 }
 0x36d   :  { %3322 = vmatprep.subr.bf16.mxu1 %v3688_v0 }
 0x370   :  { %3323 = vmatpush3.bf16.msra.mxu1 %v3570_v7 }
 0x371   :  { %3324 = vmatprep.subr.bf16.mxu1 %v3688_v0 }
 0x374   :  { %3325 = vmatpush3.bf16.msra.mxu1 %v3571_v8 }
 0x375   :  { %3326 = vmatprep.subr.bf16.mxu1 %v3688_v0 }
 0x378   :  { %3327 = vmatpush3.bf16.msra.mxu1 %v3572_v9 }
 0x379   :  { %3328 = vmatprep.subr.bf16.mxu1 %v3688_v0 }
 0x37c   :  { %3329 = vmatpush3.bf16.msra.mxu1 %v3573_v10 }
 0x3be   :  { %v3079_v11 = vpop.f32.mrf.mxu1  ;;  %v3101_v12 = vpop.f32.mrf.mxu0 }
 0x3c0   :  { %v3080_v14 = vpop.f32.mrf.mxu1  ;;  %v3102_v15 = vpop.f32.mrf.mxu0 }
 0x3c1   :  { %v3081_v16 = vadd.f32 %v3080_v14, %v3079_v11  ;;  %v3103_v17 = vadd.f32 %v3102_v15, %v3101_v12 }
 0x3c2   :  { %v3082_v18 = vpop.f32.mrf.mxu1  ;;  %v3104_v19 = vpop.f32.mrf.mxu0 }
 0x3c3   :  { %v2373_v20 = vadd.f32 %v3081_v16, %v2898_v13 }
 0x3c4   :  { %v3083_v21 = vpop.f32.mrf.mxu1  ;;  %v3105_v22 = vpop.f32.mrf.mxu0 }
 0x3c5   :  { %v2413_v23 = vadd.f32 %v3103_v17, %v2373_v20 }
 0x3de   :  { %v3123_v27 = vpop.f32.mrf.mxu1  ;;  %v3145_v28 = vpop.f32.mrf.mxu0 }
 0x3e0   :  { %v3124_v0 = vpop.f32.mrf.mxu1  ;;  %v3146_v29 = vpop.f32.mrf.mxu0 }
 0x3e1   :  { %v3125_v42 = vadd.f32 %v3124_v0, %v3123_v27  ;;  %v3147_v44 = vadd.f32 %v3146_v29, %v3145_v28 }
 0x3e2   :  { %v3126_v30 = vpop.f32.mrf.mxu1  ;;  %v3148_v31 = vpop.f32.mrf.mxu0 }
 0x3e3   :  { %v2453_v43 = vadd.f32 %v3125_v42, %v2413_v23 }
 0x3e4   :  { %v3127_v32 = vpop.f32.mrf.mxu1  ;;  %v3149_v33 = vpop.f32.mrf.mxu0 }
 0x3e5   :  { %v2493_v46 = vadd.f32 %v3147_v44, %v2453_v43 }
 0x3fe   :  { %v3167_v34 = vpop.f32.mrf.mxu1 }
 0x3ff   :  { %v3189_v35 = vpop.f32.mrf.mxu0 }
 0x400   :  { %v3168_v24 = vpop.f32.mrf.mxu1 }
 0x401   :  { %v3190_v36 = vpop.f32.mrf.mxu0  ;;  %v3169_v45 = vadd.f32 %v3168_v24, %v3167_v34 }
 0x402   :  { %v3170_v25 = vpop.f32.mrf.mxu1  ;;  %v3191_v39 = vadd.f32 %v3190_v36, %v3189_v35 }
 0x403   :  { %v3192_v37 = vpop.f32.mrf.mxu0  ;;  %v2533_v47 = vadd.f32 %v3169_v45, %v2493_v46 }
 0x404   :  { %v3171_v38 = vpop.f32.mrf.mxu1 }
 0x405   :  { %v3193_v41 = vpop.f32.mrf.mxu0  ;;  %v2573_v50 = vadd.f32 %v3191_v39, %v2533_v47 }
 0x41e   :  { %v3211_v48 = vpop.f32.mrf.mxu1 }
 0x41f   :  { %v3233_v40 = vpop.f32.mrf.mxu0 }
 0x420   :  { %v3212_v49 = vpop.f32.mrf.mxu1 }
 0x421   :  { %v3213_v51 = vadd.f32 %v3212_v49, %v3211_v48  ;;  %v3234_v52 = vpop.f32.mrf.mxu0 }
 0x422   :  { %v3214_v53 = vpop.f32.mrf.mxu1  ;;  %v3235_v55 = vadd.f32 %v3234_v52, %v3233_v40 }
 0x423   :  { %v2613_v54 = vadd.f32 %v3213_v51, %v2573_v50  ;;  %v3236_v56 = vpop.f32.mrf.mxu0 }
 0x424   :  { %v3215_v57 = vpop.f32.mrf.mxu1 }
 0x425   :  { %v2653_v58 = vadd.f32 %v3235_v55, %v2613_v54  ;;  %v3237_v59 = vpop.f32.mrf.mxu0 }
 0x427   :  { %v2658_v60 = vmax.f32 %v2653_v58, 0.0 }
 0x429   :  { %v2659_v61 = vpack.c.bf16 %v2658_v60, %v2658_v60 }
 0x42b   :  { %3331 = vmatmul.mubr.bf16.vlgmr.msra.gmra.mxu1 %v2659_v61 }
 0x4eb   :  { %v2765_v63 = vpop.f32.mrf.mxu1 }
 0x4ec   :  { %v2766_v1 = vadd.f32 %v3027_v62, %v2765_v63 }
 0x4ed   :  { %v3332_v2 = vpop.f32.mrf.mxu1 }
 0x4ee   :  { %2771 = vst [vmem:[#allocation13] sm:$0x3] %v2766_v1 }
 0x4ef   :  { %v2768_v3 = vpop.f32.mrf.mxu1 }
 0x4f0   :  { %3665 = shalt.err (!%p3662_p10)
}
 0x4f1   :  { %2781 = dma.vmem_to_hbm [thread:$0]  %s2779_s2, 32, %s4086_s11, [#allocation7]   ;;  %v3333_v4 = vpop.f32.mrf.mxu1 }
 0x4f2   :  { %3680 = dma.done.wait [#allocation7], 32  }
 0x4f3   :  { %3681 = vsyncadd [#allocation7], 4294967264 }
 0x4f4   :  { %2785 = vsyncpa [#allocation6], 1 }
 0x4f5   :  { %2786 = vsyncpa [#allocation9], 1 }
 0x4f6   :  { %2787 = vsyncpa [#allocation12], 1 }
 0x4f7   :  { %2788 = vsyncpa [#allocation7], 1 }

</bundles_post_ra>
